<compile_context>
chip_gen: v5e
topology: v5e:2x2
jax: 0.10.0
libtpu: 0.0.40
codegen_flags: <defaults>
</compile_context>

<pallas_src>
import functools

import jax
import jax.numpy as jnp
from jax.experimental import pallas as pl
from jax.experimental.pallas import tpu as pltpu


def _dspn_kernel(x1_ref, t_ref, w1_ref, b1_ref, w2_ref, b2_ref, w1t_ref, w2t_ref,
                 sets_ref, loss_ref, gnorm_ref, *, iters, lr, set_size, inv_n):
    # x1_ref: (B, C)  summed-set state     t_ref:  (B, O) target representation
    # w1_ref: (C, D)  b1_ref: (1, D)       w2_ref: (D, O) b2_ref: (1, O)
    # w1t_ref:(D, C)  w2t_ref:(O, D)       (pre-transposed for the backward pass)
    # sets_ref: (iters, B, C)   loss_ref/gnorm_ref: (iters, 1)
    x1 = x1_ref[...]
    t = t_ref[...]
    w1 = w1_ref[...]
    b1 = b1_ref[...]
    w2 = w2_ref[...]
    b2 = b2_ref[...]
    w1t = w1t_ref[...]
    w2t = w2t_ref[...]

    s_f = float(set_size)
    lr_s = float(lr) * s_f

    for i in range(iters):  # static unroll; iters is small
        # ---- encoder forward -------------------------------------------
        z = jnp.dot(x1, w1, preferred_element_type=jnp.float32) + b1     # (B, D)
        h = jnp.maximum(z, 0.0)
        y = jnp.dot(h, w2, preferred_element_type=jnp.float32) + b2      # (B, O)

        # ---- smooth-L1 loss (mean, beta = 1) -----------------------------
        d = y - t
        ad = jnp.abs(d)
        quad = ad < 1.0
        elem = jnp.where(quad, 0.5 * d * d, ad - 0.5) * inv_n
        loss11 = jnp.sum(jnp.sum(elem, axis=1, keepdims=True),
                         axis=0, keepdims=True)                           # (1, 1)

        # ---- analytic backward to the set --------------------------------
        dy = jnp.where(quad, d, jnp.where(d > 0.0, 1.0, -1.0)) * inv_n    # (B, O)
        dh = jnp.dot(dy, w2t, preferred_element_type=jnp.float32)         # (B, D)
        dz = jnp.where(z > 0.0, dh, 0.0)
        g = jnp.dot(dz, w1t, preferred_element_type=jnp.float32)          # (B, C)

        # Frobenius norm of the full (B, C, S) set gradient (constant over S).
        gsq = g * g * s_f
        gn11 = jnp.sqrt(jnp.sum(jnp.sum(gsq, axis=1, keepdims=True),
                                axis=0, keepdims=True))                    # (1, 1)

        # ---- inner SGD step, tracked on the summed state ------------------
        x1 = x1 - lr_s * g

        sets_ref[i] = x1
        loss_ref[pl.ds(i, 1), :] = loss11
        gnorm_ref[pl.ds(i, 1), :] = gn11


def dspn_forward(target_repr, starting_set, w1, b1, w2, b2, *, iters, lr):
    B, O = target_repr.shape
    _, C, S = starting_set.shape

    # Wrapper-side arg prep (free layout plumbing): initial summed state and
    # pre-transposed weights for the backward matmuls.
    x1_0 = jnp.broadcast_to(jnp.sum(starting_set, axis=2), (B, C)).astype(jnp.float32)
    w1t = jnp.transpose(w1)
    w2t = jnp.transpose(w2)

    kernel = functools.partial(
        _dspn_kernel, iters=iters, lr=float(lr), set_size=S,
        inv_n=1.0 / float(B * O))

    vmem = lambda: pl.BlockSpec(memory_space=pltpu.MemorySpace.VMEM)
    sets, losses, gnorms = pl.pallas_call(
        kernel,
        out_shape=(
            jax.ShapeDtypeStruct((iters, B, C), jnp.float32),
            jax.ShapeDtypeStruct((iters, 1), jnp.float32),
            jax.ShapeDtypeStruct((iters, 1), jnp.float32),
        ),
        in_specs=[vmem() for _ in range(8)],
        out_specs=(vmem(), vmem(), vmem()),
    )(x1_0, target_repr, w1, b1, w2, b2, w1t, w2t)

    # Match the PyTorch return structure: first entry is the full expanded
    # starting set (B, C, S), subsequent entries are the per-iteration sums.
    intermediate_sets = [jnp.broadcast_to(starting_set, (B, C, S))]
    intermediate_sets += [sets[i] for i in range(iters)]
    repr_losses = [losses[i, 0] for i in range(iters)]
    grad_norms = [gnorms[i, 0] for i in range(iters)]
    return intermediate_sets, None, repr_losses, grad_norms


# ----------------------------- helpers / reference -----------------------------

def init_linear_params(key, in_features, out_features):
    # PyTorch nn.Linear default init: U(-1/sqrt(in), 1/sqrt(in)); stored as
    # (in, out) so the kernel does x @ W.
    kw, kb = jax.random.split(key)
    bound = 1.0 / (in_features ** 0.5)
    w = jax.random.uniform(kw, (in_features, out_features), jnp.float32, -bound, bound)
    b = jax.random.uniform(kb, (1, out_features), jnp.float32, -bound, bound)
    return w, b


def _encoder_ref(x, w1, b1, w2, b2):
    x1 = jnp.sum(x, axis=2)
    h = jnp.maximum(x1 @ w1 + b1, 0.0)
    return h @ w2 + b2


def _smooth_l1_mean(pred, target):
    d = pred - target
    ad = jnp.abs(d)
    return jnp.mean(jnp.where(ad < 1.0, 0.5 * d * d, ad - 0.5))


def dspn_reference(target_repr, starting_set, w1, b1, w2, b2, *, iters, lr):
    B = target_repr.shape[0]
    _, C, S = starting_set.shape
    current = jnp.broadcast_to(starting_set, (B, C, S))
    inter = [current]
    losses, gnorms = [], []

    def loss_fn(cs):
        return _smooth_l1_mean(_encoder_ref(cs, w1, b1, w2, b2), target_repr)

    vg = jax.jit(jax.value_and_grad(loss_fn))
    for _ in range(iters):
        loss, g = vg(current)
        current = current - lr * g
        inter.append(jnp.sum(current, axis=2))
        losses.append(loss)
        gnorms.append(jnp.linalg.norm(g.reshape(-1)))
    return inter, None, losses, gnorms


if __name__ == "__main__":
    # DSPN(encoder=MLPEncoder(C=16 -> D=32 -> O=16), set_channels=16,
    #      max_set_size=8, iters=10, lr=0.5), batch = 8.
    B, C, S = 8, 16, 8        # batch, set_channels, max_set_size
    D, O = 32, 16             # encoder hidden dim, representation channels
    ITERS, LR = 10, 0.5

    key = jax.random.PRNGKey(0)
    kt, ks, k1, k2 = jax.random.split(key, 4)

    target_repr = jax.random.normal(kt, (B, O), dtype=jnp.float32)
    starting_set = jax.random.uniform(ks, (1, C, S), dtype=jnp.float32)  # torch.rand
    w1, b1 = init_linear_params(k1, C, D)
    w2, b2 = init_linear_params(k2, D, O)

    sets, _, losses, gnorms = dspn_forward(
        target_repr, starting_set, w1, b1, w2, b2, iters=ITERS, lr=LR)
    jax.block_until_ready((sets, losses, gnorms))

    ref_sets, _, ref_losses, ref_gnorms = dspn_reference(
        target_repr, starting_set, w1, b1, w2, b2, iters=ITERS, lr=LR)

    assert len(sets) == ITERS + 1 and len(losses) == ITERS and len(gnorms) == ITERS
    assert sets[0].shape == (B, C, S)
    assert jnp.allclose(sets[0], ref_sets[0], atol=1e-5, rtol=1e-5)
    for i in range(1, ITERS + 1):
        assert sets[i].shape == (B, C)
        assert jnp.allclose(sets[i], ref_sets[i], atol=1e-4, rtol=1e-4), f"set {i}"
    for i in range(ITERS):
        assert jnp.allclose(losses[i], ref_losses[i], atol=1e-5, rtol=1e-4), f"loss {i}"
        assert jnp.allclose(gnorms[i], ref_gnorms[i], atol=1e-5, rtol=1e-4), f"gnorm {i}"

    print("KERNEL_OK")
</pallas_src>

<mosaic_0001>
module attributes {stable_mosaic.version = 11 : i64} {
  func.func @_dspn_kernel(%arg0: memref<8x16xf32, #tpu.memory_space<vmem>>, %arg1: memref<8x16xf32, #tpu.memory_space<vmem>>, %arg2: memref<16x32xf32, #tpu.memory_space<vmem>>, %arg3: memref<1x32xf32, #tpu.memory_space<vmem>>, %arg4: memref<32x16xf32, #tpu.memory_space<vmem>>, %arg5: memref<1x16xf32, #tpu.memory_space<vmem>>, %arg6: memref<32x16xf32, #tpu.memory_space<vmem>>, %arg7: memref<16x32xf32, #tpu.memory_space<vmem>>, %arg8: memref<10x8x16xf32, #tpu.memory_space<vmem>>, %arg9: memref<10x1xf32, #tpu.memory_space<vmem>>, %arg10: memref<10x1xf32, #tpu.memory_space<vmem>>) attributes {dimension_semantics = [], scalar_prefetch = 0 : i64, scratch_operands = 0 : i64, tpu.core_type = #tpu.core_type<tc>} {
    %c0 = arith.constant 0 : index
    %c0_0 = arith.constant 0 : index
    %0 = vector.load %arg0[%c0, %c0_0] : memref<8x16xf32, #tpu.memory_space<vmem>>, vector<8x16xf32>
    %c0_1 = arith.constant 0 : index
    %c0_2 = arith.constant 0 : index
    %1 = vector.load %arg1[%c0_1, %c0_2] : memref<8x16xf32, #tpu.memory_space<vmem>>, vector<8x16xf32>
    %c0_3 = arith.constant 0 : index
    %c0_4 = arith.constant 0 : index
    %2 = vector.load %arg2[%c0_3, %c0_4] : memref<16x32xf32, #tpu.memory_space<vmem>>, vector<16x32xf32>
    %c0_5 = arith.constant 0 : index
    %c0_6 = arith.constant 0 : index
    %3 = vector.load %arg3[%c0_5, %c0_6] : memref<1x32xf32, #tpu.memory_space<vmem>>, vector<1x32xf32>
    %c0_7 = arith.constant 0 : index
    %c0_8 = arith.constant 0 : index
    %4 = vector.load %arg4[%c0_7, %c0_8] : memref<32x16xf32, #tpu.memory_space<vmem>>, vector<32x16xf32>
    %c0_9 = arith.constant 0 : index
    %c0_10 = arith.constant 0 : index
    %5 = vector.load %arg5[%c0_9, %c0_10] : memref<1x16xf32, #tpu.memory_space<vmem>>, vector<1x16xf32>
    %c0_11 = arith.constant 0 : index
    %c0_12 = arith.constant 0 : index
    %6 = vector.load %arg6[%c0_11, %c0_12] : memref<32x16xf32, #tpu.memory_space<vmem>>, vector<32x16xf32>
    %c0_13 = arith.constant 0 : index
    %c0_14 = arith.constant 0 : index
    %7 = vector.load %arg7[%c0_13, %c0_14] : memref<16x32xf32, #tpu.memory_space<vmem>>, vector<16x32xf32>
    %cst = arith.constant dense<0.000000e+00> : vector<8x32xf32>
    %8 = tpu.matmul %0, %2, %cst {dimension_numbers = #tpu.dot_dimension_numbers<[1], [0], [0], [1], [0, 0, 1, 1], [], []>} : vector<8x16xf32>, vector<16x32xf32>, vector<8x32xf32> -> vector<8x32xf32>
    %9 = vector.broadcast %3 : vector<1x32xf32> to vector<8x32xf32>
    %10 = arith.addf %8, %9 : vector<8x32xf32>
    %cst_15 = arith.constant 0.000000e+00 : f32
    %11 = vector.broadcast %cst_15 : f32 to vector<8x32xf32>
    %12 = arith.maximumf %10, %11 : vector<8x32xf32>
    %cst_16 = arith.constant dense<0.000000e+00> : vector<8x16xf32>
    %13 = tpu.matmul %12, %4, %cst_16 {dimension_numbers = #tpu.dot_dimension_numbers<[1], [0], [0], [1], [0, 0, 1, 1], [], []>} : vector<8x32xf32>, vector<32x16xf32>, vector<8x16xf32> -> vector<8x16xf32>
    %14 = vector.broadcast %5 : vector<1x16xf32> to vector<8x16xf32>
    %15 = arith.addf %13, %14 : vector<8x16xf32>
    %16 = arith.subf %15, %1 : vector<8x16xf32>
    %17 = math.absf %16 : vector<8x16xf32>
    %cst_17 = arith.constant 1.000000e+00 : f32
    %18 = vector.broadcast %cst_17 : f32 to vector<8x16xf32>
    %19 = arith.cmpf olt, %17, %18 : vector<8x16xf32>
    %cst_18 = arith.constant 5.000000e-01 : f32
    %20 = vector.broadcast %cst_18 : f32 to vector<8x16xf32>
    %21 = arith.mulf %20, %16 : vector<8x16xf32>
    %22 = arith.mulf %21, %16 : vector<8x16xf32>
    %cst_19 = arith.constant 5.000000e-01 : f32
    %23 = vector.broadcast %cst_19 : f32 to vector<8x16xf32>
    %24 = arith.subf %17, %23 : vector<8x16xf32>
    %25 = arith.select %19, %22, %24 : vector<8x16xi1>, vector<8x16xf32>
    %cst_20 = arith.constant 7.812500e-03 : f32
    %26 = vector.broadcast %cst_20 : f32 to vector<8x16xf32>
    %27 = arith.mulf %25, %26 : vector<8x16xf32>
    %cst_21 = arith.constant dense<0.000000e+00> : vector<8xf32>
    %28 = vector.multi_reduction <add>, %27, %cst_21 [1] : vector<8x16xf32> to vector<8xf32>
    %29 = vector.shape_cast %28 : vector<8xf32> to vector<8x1xf32>
    %cst_22 = arith.constant dense<0.000000e+00> : vector<1xf32>
    %30 = vector.multi_reduction <add>, %29, %cst_22 [0] : vector<8x1xf32> to vector<1xf32>
    %31 = vector.shape_cast %30 : vector<1xf32> to vector<1x1xf32>
    %cst_23 = arith.constant 0.000000e+00 : f32
    %32 = vector.broadcast %cst_23 : f32 to vector<8x16xf32>
    %33 = arith.cmpf ogt, %16, %32 : vector<8x16xf32>
    %cst_24 = arith.constant 1.000000e+00 : f32
    %cst_25 = arith.constant -1.000000e+00 : f32
    %34 = vector.broadcast %cst_24 : f32 to vector<8x16xf32>
    %35 = vector.broadcast %cst_25 : f32 to vector<8x16xf32>
    %36 = arith.select %33, %34, %35 : vector<8x16xi1>, vector<8x16xf32>
    %37 = arith.select %19, %16, %36 : vector<8x16xi1>, vector<8x16xf32>
    %cst_26 = arith.constant 7.812500e-03 : f32
    %38 = vector.broadcast %cst_26 : f32 to vector<8x16xf32>
    %39 = arith.mulf %37, %38 : vector<8x16xf32>
    %cst_27 = arith.constant dense<0.000000e+00> : vector<8x32xf32>
    %40 = tpu.matmul %39, %7, %cst_27 {dimension_numbers = #tpu.dot_dimension_numbers<[1], [0], [0], [1], [0, 0, 1, 1], [], []>} : vector<8x16xf32>, vector<16x32xf32>, vector<8x32xf32> -> vector<8x32xf32>
    %cst_28 = arith.constant 0.000000e+00 : f32
    %41 = vector.broadcast %cst_28 : f32 to vector<8x32xf32>
    %42 = arith.cmpf ogt, %10, %41 : vector<8x32xf32>
    %cst_29 = arith.constant 0.000000e+00 : f32
    %43 = vector.broadcast %cst_29 : f32 to vector<8x32xf32>
    %44 = arith.select %42, %40, %43 : vector<8x32xi1>, vector<8x32xf32>
    %cst_30 = arith.constant dense<0.000000e+00> : vector<8x16xf32>
    %45 = tpu.matmul %44, %6, %cst_30 {dimension_numbers = #tpu.dot_dimension_numbers<[1], [0], [0], [1], [0, 0, 1, 1], [], []>} : vector<8x32xf32>, vector<32x16xf32>, vector<8x16xf32> -> vector<8x16xf32>
    %46 = arith.mulf %45, %45 : vector<8x16xf32>
    %cst_31 = arith.constant 8.000000e+00 : f32
    %47 = vector.broadcast %cst_31 : f32 to vector<8x16xf32>
    %48 = arith.mulf %46, %47 : vector<8x16xf32>
    %cst_32 = arith.constant dense<0.000000e+00> : vector<8xf32>
    %49 = vector.multi_reduction <add>, %48, %cst_32 [1] : vector<8x16xf32> to vector<8xf32>
    %50 = vector.shape_cast %49 : vector<8xf32> to vector<8x1xf32>
    %cst_33 = arith.constant dense<0.000000e+00> : vector<1xf32>
    %51 = vector.multi_reduction <add>, %50, %cst_33 [0] : vector<8x1xf32> to vector<1xf32>
    %52 = vector.shape_cast %51 : vector<1xf32> to vector<1x1xf32>
    %53 = math.sqrt %52 : vector<1x1xf32>
    %cst_34 = arith.constant 4.000000e+00 : f32
    %54 = vector.broadcast %cst_34 : f32 to vector<8x16xf32>
    %55 = arith.mulf %54, %45 : vector<8x16xf32>
    %56 = arith.subf %0, %55 : vector<8x16xf32>
    %c0_35 = arith.constant 0 : index
    %c0_36 = arith.constant 0 : index
    %c0_37 = arith.constant 0 : index
    %57 = vector.load %arg8[%c0_35, %c0_36, %c0_37] : memref<10x8x16xf32, #tpu.memory_space<vmem>>, vector<1x8x16xf32>
    %58 = vector.shape_cast %57 : vector<1x8x16xf32> to vector<8x16xf32>
    %59 = vector.shape_cast %56 : vector<8x16xf32> to vector<1x8x16xf32>
    tpu.vector_store %arg8[%c0_35, %c0_36, %c0_37], %59 {strides = array<i32>} : memref<10x8x16xf32, #tpu.memory_space<vmem>>, vector<1x8x16xf32>,
    %c0_38 = arith.constant 0 : index
    %c0_39 = arith.constant 0 : index
    %60 = vector.load %arg9[%c0_38, %c0_39] : memref<10x1xf32, #tpu.memory_space<vmem>>, vector<1x1xf32>
    tpu.vector_store %arg9[%c0_38, %c0_39], %31 {strides = array<i32>} : memref<10x1xf32, #tpu.memory_space<vmem>>, vector<1x1xf32>,
    %c0_40 = arith.constant 0 : index
    %c0_41 = arith.constant 0 : index
    %61 = vector.load %arg10[%c0_40, %c0_41] : memref<10x1xf32, #tpu.memory_space<vmem>>, vector<1x1xf32>
    tpu.vector_store %arg10[%c0_40, %c0_41], %53 {strides = array<i32>} : memref<10x1xf32, #tpu.memory_space<vmem>>, vector<1x1xf32>,
    %cst_42 = arith.constant dense<0.000000e+00> : vector<8x32xf32>
    %62 = tpu.matmul %56, %2, %cst_42 {dimension_numbers = #tpu.dot_dimension_numbers<[1], [0], [0], [1], [0, 0, 1, 1], [], []>} : vector<8x16xf32>, vector<16x32xf32>, vector<8x32xf32> -> vector<8x32xf32>
    %63 = vector.broadcast %3 : vector<1x32xf32> to vector<8x32xf32>
    %64 = arith.addf %62, %63 : vector<8x32xf32>
    %cst_43 = arith.constant 0.000000e+00 : f32
    %65 = vector.broadcast %cst_43 : f32 to vector<8x32xf32>
    %66 = arith.maximumf %64, %65 : vector<8x32xf32>
    %cst_44 = arith.constant dense<0.000000e+00> : vector<8x16xf32>
    %67 = tpu.matmul %66, %4, %cst_44 {dimension_numbers = #tpu.dot_dimension_numbers<[1], [0], [0], [1], [0, 0, 1, 1], [], []>} : vector<8x32xf32>, vector<32x16xf32>, vector<8x16xf32> -> vector<8x16xf32>
    %68 = vector.broadcast %5 : vector<1x16xf32> to vector<8x16xf32>
    %69 = arith.addf %67, %68 : vector<8x16xf32>
    %70 = arith.subf %69, %1 : vector<8x16xf32>
    %71 = math.absf %70 : vector<8x16xf32>
    %cst_45 = arith.constant 1.000000e+00 : f32
    %72 = vector.broadcast %cst_45 : f32 to vector<8x16xf32>
    %73 = arith.cmpf olt, %71, %72 : vector<8x16xf32>
    %cst_46 = arith.constant 5.000000e-01 : f32
    %74 = vector.broadcast %cst_46 : f32 to vector<8x16xf32>
    %75 = arith.mulf %74, %70 : vector<8x16xf32>
    %76 = arith.mulf %75, %70 : vector<8x16xf32>
    %cst_47 = arith.constant 5.000000e-01 : f32
    %77 = vector.broadcast %cst_47 : f32 to vector<8x16xf32>
    %78 = arith.subf %71, %77 : vector<8x16xf32>
    %79 = arith.select %73, %76, %78 : vector<8x16xi1>, vector<8x16xf32>
    %cst_48 = arith.constant 7.812500e-03 : f32
    %80 = vector.broadcast %cst_48 : f32 to vector<8x16xf32>
    %81 = arith.mulf %79, %80 : vector<8x16xf32>
    %cst_49 = arith.constant dense<0.000000e+00> : vector<8xf32>
    %82 = vector.multi_reduction <add>, %81, %cst_49 [1] : vector<8x16xf32> to vector<8xf32>
    %83 = vector.shape_cast %82 : vector<8xf32> to vector<8x1xf32>
    %cst_50 = arith.constant dense<0.000000e+00> : vector<1xf32>
    %84 = vector.multi_reduction <add>, %83, %cst_50 [0] : vector<8x1xf32> to vector<1xf32>
    %85 = vector.shape_cast %84 : vector<1xf32> to vector<1x1xf32>
    %cst_51 = arith.constant 0.000000e+00 : f32
    %86 = vector.broadcast %cst_51 : f32 to vector<8x16xf32>
    %87 = arith.cmpf ogt, %70, %86 : vector<8x16xf32>
    %cst_52 = arith.constant 1.000000e+00 : f32
    %cst_53 = arith.constant -1.000000e+00 : f32
    %88 = vector.broadcast %cst_52 : f32 to vector<8x16xf32>
    %89 = vector.broadcast %cst_53 : f32 to vector<8x16xf32>
    %90 = arith.select %87, %88, %89 : vector<8x16xi1>, vector<8x16xf32>
    %91 = arith.select %73, %70, %90 : vector<8x16xi1>, vector<8x16xf32>
    %cst_54 = arith.constant 7.812500e-03 : f32
    %92 = vector.broadcast %cst_54 : f32 to vector<8x16xf32>
    %93 = arith.mulf %91, %92 : vector<8x16xf32>
    %cst_55 = arith.constant dense<0.000000e+00> : vector<8x32xf32>
    %94 = tpu.matmul %93, %7, %cst_55 {dimension_numbers = #tpu.dot_dimension_numbers<[1], [0], [0], [1], [0, 0, 1, 1], [], []>} : vector<8x16xf32>, vector<16x32xf32>, vector<8x32xf32> -> vector<8x32xf32>
    %cst_56 = arith.constant 0.000000e+00 : f32
    %95 = vector.broadcast %cst_56 : f32 to vector<8x32xf32>
    %96 = arith.cmpf ogt, %64, %95 : vector<8x32xf32>
    %cst_57 = arith.constant 0.000000e+00 : f32
    %97 = vector.broadcast %cst_57 : f32 to vector<8x32xf32>
    %98 = arith.select %96, %94, %97 : vector<8x32xi1>, vector<8x32xf32>
    %cst_58 = arith.constant dense<0.000000e+00> : vector<8x16xf32>
    %99 = tpu.matmul %98, %6, %cst_58 {dimension_numbers = #tpu.dot_dimension_numbers<[1], [0], [0], [1], [0, 0, 1, 1], [], []>} : vector<8x32xf32>, vector<32x16xf32>, vector<8x16xf32> -> vector<8x16xf32>
    %100 = arith.mulf %99, %99 : vector<8x16xf32>
    %cst_59 = arith.constant 8.000000e+00 : f32
    %101 = vector.broadcast %cst_59 : f32 to vector<8x16xf32>
    %102 = arith.mulf %100, %101 : vector<8x16xf32>
    %cst_60 = arith.constant dense<0.000000e+00> : vector<8xf32>
    %103 = vector.multi_reduction <add>, %102, %cst_60 [1] : vector<8x16xf32> to vector<8xf32>
    %104 = vector.shape_cast %103 : vector<8xf32> to vector<8x1xf32>
    %cst_61 = arith.constant dense<0.000000e+00> : vector<1xf32>
    %105 = vector.multi_reduction <add>, %104, %cst_61 [0] : vector<8x1xf32> to vector<1xf32>
    %106 = vector.shape_cast %105 : vector<1xf32> to vector<1x1xf32>
    %107 = math.sqrt %106 : vector<1x1xf32>
    %cst_62 = arith.constant 4.000000e+00 : f32
    %108 = vector.broadcast %cst_62 : f32 to vector<8x16xf32>
    %109 = arith.mulf %108, %99 : vector<8x16xf32>
    %110 = arith.subf %56, %109 : vector<8x16xf32>
    %c1 = arith.constant 1 : index
    %c0_63 = arith.constant 0 : index
    %c0_64 = arith.constant 0 : index
    %111 = vector.load %arg8[%c1, %c0_63, %c0_64] : memref<10x8x16xf32, #tpu.memory_space<vmem>>, vector<1x8x16xf32>
    %112 = vector.shape_cast %111 : vector<1x8x16xf32> to vector<8x16xf32>
    %113 = vector.shape_cast %110 : vector<8x16xf32> to vector<1x8x16xf32>
    tpu.vector_store %arg8[%c1, %c0_63, %c0_64], %113 {strides = array<i32>} : memref<10x8x16xf32, #tpu.memory_space<vmem>>, vector<1x8x16xf32>,
    %c1_65 = arith.constant 1 : index
    %c0_66 = arith.constant 0 : index
    %114 = vector.load %arg9[%c1_65, %c0_66] : memref<10x1xf32, #tpu.memory_space<vmem>>, vector<1x1xf32>
    tpu.vector_store %arg9[%c1_65, %c0_66], %85 {strides = array<i32>} : memref<10x1xf32, #tpu.memory_space<vmem>>, vector<1x1xf32>,
    %c1_67 = arith.constant 1 : index
    %c0_68 = arith.constant 0 : index
    %115 = vector.load %arg10[%c1_67, %c0_68] : memref<10x1xf32, #tpu.memory_space<vmem>>, vector<1x1xf32>
    tpu.vector_store %arg10[%c1_67, %c0_68], %107 {strides = array<i32>} : memref<10x1xf32, #tpu.memory_space<vmem>>, vector<1x1xf32>,
    %cst_69 = arith.constant dense<0.000000e+00> : vector<8x32xf32>
    %116 = tpu.matmul %110, %2, %cst_69 {dimension_numbers = #tpu.dot_dimension_numbers<[1], [0], [0], [1], [0, 0, 1, 1], [], []>} : vector<8x16xf32>, vector<16x32xf32>, vector<8x32xf32> -> vector<8x32xf32>
    %117 = vector.broadcast %3 : vector<1x32xf32> to vector<8x32xf32>
    %118 = arith.addf %116, %117 : vector<8x32xf32>
    %cst_70 = arith.constant 0.000000e+00 : f32
    %119 = vector.broadcast %cst_70 : f32 to vector<8x32xf32>
    %120 = arith.maximumf %118, %119 : vector<8x32xf32>
    %cst_71 = arith.constant dense<0.000000e+00> : vector<8x16xf32>
    %121 = tpu.matmul %120, %4, %cst_71 {dimension_numbers = #tpu.dot_dimension_numbers<[1], [0], [0], [1], [0, 0, 1, 1], [], []>} : vector<8x32xf32>, vector<32x16xf32>, vector<8x16xf32> -> vector<8x16xf32>
    %122 = vector.broadcast %5 : vector<1x16xf32> to vector<8x16xf32>
    %123 = arith.addf %121, %122 : vector<8x16xf32>
    %124 = arith.subf %123, %1 : vector<8x16xf32>
    %125 = math.absf %124 : vector<8x16xf32>
    %cst_72 = arith.constant 1.000000e+00 : f32
    %126 = vector.broadcast %cst_72 : f32 to vector<8x16xf32>
    %127 = arith.cmpf olt, %125, %126 : vector<8x16xf32>
    %cst_73 = arith.constant 5.000000e-01 : f32
    %128 = vector.broadcast %cst_73 : f32 to vector<8x16xf32>
    %129 = arith.mulf %128, %124 : vector<8x16xf32>
    %130 = arith.mulf %129, %124 : vector<8x16xf32>
    %cst_74 = arith.constant 5.000000e-01 : f32
    %131 = vector.broadcast %cst_74 : f32 to vector<8x16xf32>
    %132 = arith.subf %125, %131 : vector<8x16xf32>
    %133 = arith.select %127, %130, %132 : vector<8x16xi1>, vector<8x16xf32>
    %cst_75 = arith.constant 7.812500e-03 : f32
    %134 = vector.broadcast %cst_75 : f32 to vector<8x16xf32>
    %135 = arith.mulf %133, %134 : vector<8x16xf32>
    %cst_76 = arith.constant dense<0.000000e+00> : vector<8xf32>
    %136 = vector.multi_reduction <add>, %135, %cst_76 [1] : vector<8x16xf32> to vector<8xf32>
    %137 = vector.shape_cast %136 : vector<8xf32> to vector<8x1xf32>
    %cst_77 = arith.constant dense<0.000000e+00> : vector<1xf32>
    %138 = vector.multi_reduction <add>, %137, %cst_77 [0] : vector<8x1xf32> to vector<1xf32>
    %139 = vector.shape_cast %138 : vector<1xf32> to vector<1x1xf32>
    %cst_78 = arith.constant 0.000000e+00 : f32
    %140 = vector.broadcast %cst_78 : f32 to vector<8x16xf32>
    %141 = arith.cmpf ogt, %124, %140 : vector<8x16xf32>
    %cst_79 = arith.constant 1.000000e+00 : f32
    %cst_80 = arith.constant -1.000000e+00 : f32
    %142 = vector.broadcast %cst_79 : f32 to vector<8x16xf32>
    %143 = vector.broadcast %cst_80 : f32 to vector<8x16xf32>
    %144 = arith.select %141, %142, %143 : vector<8x16xi1>, vector<8x16xf32>
    %145 = arith.select %127, %124, %144 : vector<8x16xi1>, vector<8x16xf32>
    %cst_81 = arith.constant 7.812500e-03 : f32
    %146 = vector.broadcast %cst_81 : f32 to vector<8x16xf32>
    %147 = arith.mulf %145, %146 : vector<8x16xf32>
    %cst_82 = arith.constant dense<0.000000e+00> : vector<8x32xf32>
    %148 = tpu.matmul %147, %7, %cst_82 {dimension_numbers = #tpu.dot_dimension_numbers<[1], [0], [0], [1], [0, 0, 1, 1], [], []>} : vector<8x16xf32>, vector<16x32xf32>, vector<8x32xf32> -> vector<8x32xf32>
    %cst_83 = arith.constant 0.000000e+00 : f32
    %149 = vector.broadcast %cst_83 : f32 to vector<8x32xf32>
    %150 = arith.cmpf ogt, %118, %149 : vector<8x32xf32>
    %cst_84 = arith.constant 0.000000e+00 : f32
    %151 = vector.broadcast %cst_84 : f32 to vector<8x32xf32>
    %152 = arith.select %150, %148, %151 : vector<8x32xi1>, vector<8x32xf32>
    %cst_85 = arith.constant dense<0.000000e+00> : vector<8x16xf32>
    %153 = tpu.matmul %152, %6, %cst_85 {dimension_numbers = #tpu.dot_dimension_numbers<[1], [0], [0], [1], [0, 0, 1, 1], [], []>} : vector<8x32xf32>, vector<32x16xf32>, vector<8x16xf32> -> vector<8x16xf32>
    %154 = arith.mulf %153, %153 : vector<8x16xf32>
    %cst_86 = arith.constant 8.000000e+00 : f32
    %155 = vector.broadcast %cst_86 : f32 to vector<8x16xf32>
    %156 = arith.mulf %154, %155 : vector<8x16xf32>
    %cst_87 = arith.constant dense<0.000000e+00> : vector<8xf32>
    %157 = vector.multi_reduction <add>, %156, %cst_87 [1] : vector<8x16xf32> to vector<8xf32>
    %158 = vector.shape_cast %157 : vector<8xf32> to vector<8x1xf32>
    %cst_88 = arith.constant dense<0.000000e+00> : vector<1xf32>
    %159 = vector.multi_reduction <add>, %158, %cst_88 [0] : vector<8x1xf32> to vector<1xf32>
    %160 = vector.shape_cast %159 : vector<1xf32> to vector<1x1xf32>
    %161 = math.sqrt %160 : vector<1x1xf32>
    %cst_89 = arith.constant 4.000000e+00 : f32
    %162 = vector.broadcast %cst_89 : f32 to vector<8x16xf32>
    %163 = arith.mulf %162, %153 : vector<8x16xf32>
    %164 = arith.subf %110, %163 : vector<8x16xf32>
    %c2 = arith.constant 2 : index
    %c0_90 = arith.constant 0 : index
    %c0_91 = arith.constant 0 : index
    %165 = vector.load %arg8[%c2, %c0_90, %c0_91] : memref<10x8x16xf32, #tpu.memory_space<vmem>>, vector<1x8x16xf32>
    %166 = vector.shape_cast %165 : vector<1x8x16xf32> to vector<8x16xf32>
    %167 = vector.shape_cast %164 : vector<8x16xf32> to vector<1x8x16xf32>
    tpu.vector_store %arg8[%c2, %c0_90, %c0_91], %167 {strides = array<i32>} : memref<10x8x16xf32, #tpu.memory_space<vmem>>, vector<1x8x16xf32>,
    %c2_92 = arith.constant 2 : index
    %c0_93 = arith.constant 0 : index
    %168 = vector.load %arg9[%c2_92, %c0_93] : memref<10x1xf32, #tpu.memory_space<vmem>>, vector<1x1xf32>
    tpu.vector_store %arg9[%c2_92, %c0_93], %139 {strides = array<i32>} : memref<10x1xf32, #tpu.memory_space<vmem>>, vector<1x1xf32>,
    %c2_94 = arith.constant 2 : index
    %c0_95 = arith.constant 0 : index
    %169 = vector.load %arg10[%c2_94, %c0_95] : memref<10x1xf32, #tpu.memory_space<vmem>>, vector<1x1xf32>
    tpu.vector_store %arg10[%c2_94, %c0_95], %161 {strides = array<i32>} : memref<10x1xf32, #tpu.memory_space<vmem>>, vector<1x1xf32>,
    %cst_96 = arith.constant dense<0.000000e+00> : vector<8x32xf32>
    %170 = tpu.matmul %164, %2, %cst_96 {dimension_numbers = #tpu.dot_dimension_numbers<[1], [0], [0], [1], [0, 0, 1, 1], [], []>} : vector<8x16xf32>, vector<16x32xf32>, vector<8x32xf32> -> vector<8x32xf32>
    %171 = vector.broadcast %3 : vector<1x32xf32> to vector<8x32xf32>
    %172 = arith.addf %170, %171 : vector<8x32xf32>
    %cst_97 = arith.constant 0.000000e+00 : f32
    %173 = vector.broadcast %cst_97 : f32 to vector<8x32xf32>
    %174 = arith.maximumf %172, %173 : vector<8x32xf32>
    %cst_98 = arith.constant dense<0.000000e+00> : vector<8x16xf32>
    %175 = tpu.matmul %174, %4, %cst_98 {dimension_numbers = #tpu.dot_dimension_numbers<[1], [0], [0], [1], [0, 0, 1, 1], [], []>} : vector<8x32xf32>, vector<32x16xf32>, vector<8x16xf32> -> vector<8x16xf32>
    %176 = vector.broadcast %5 : vector<1x16xf32> to vector<8x16xf32>
    %177 = arith.addf %175, %176 : vector<8x16xf32>
    %178 = arith.subf %177, %1 : vector<8x16xf32>
    %179 = math.absf %178 : vector<8x16xf32>
    %cst_99 = arith.constant 1.000000e+00 : f32
    %180 = vector.broadcast %cst_99 : f32 to vector<8x16xf32>
    %181 = arith.cmpf olt, %179, %180 : vector<8x16xf32>
    %cst_100 = arith.constant 5.000000e-01 : f32
    %182 = vector.broadcast %cst_100 : f32 to vector<8x16xf32>
    %183 = arith.mulf %182, %178 : vector<8x16xf32>
    %184 = arith.mulf %183, %178 : vector<8x16xf32>
    %cst_101 = arith.constant 5.000000e-01 : f32
    %185 = vector.broadcast %cst_101 : f32 to vector<8x16xf32>
    %186 = arith.subf %179, %185 : vector<8x16xf32>
    %187 = arith.select %181, %184, %186 : vector<8x16xi1>, vector<8x16xf32>
    %cst_102 = arith.constant 7.812500e-03 : f32
    %188 = vector.broadcast %cst_102 : f32 to vector<8x16xf32>
    %189 = arith.mulf %187, %188 : vector<8x16xf32>
    %cst_103 = arith.constant dense<0.000000e+00> : vector<8xf32>
    %190 = vector.multi_reduction <add>, %189, %cst_103 [1] : vector<8x16xf32> to vector<8xf32>
    %191 = vector.shape_cast %190 : vector<8xf32> to vector<8x1xf32>
    %cst_104 = arith.constant dense<0.000000e+00> : vector<1xf32>
    %192 = vector.multi_reduction <add>, %191, %cst_104 [0] : vector<8x1xf32> to vector<1xf32>
    %193 = vector.shape_cast %192 : vector<1xf32> to vector<1x1xf32>
    %cst_105 = arith.constant 0.000000e+00 : f32
    %194 = vector.broadcast %cst_105 : f32 to vector<8x16xf32>
    %195 = arith.cmpf ogt, %178, %194 : vector<8x16xf32>
    %cst_106 = arith.constant 1.000000e+00 : f32
    %cst_107 = arith.constant -1.000000e+00 : f32
    %196 = vector.broadcast %cst_106 : f32 to vector<8x16xf32>
    %197 = vector.broadcast %cst_107 : f32 to vector<8x16xf32>
    %198 = arith.select %195, %196, %197 : vector<8x16xi1>, vector<8x16xf32>
    %199 = arith.select %181, %178, %198 : vector<8x16xi1>, vector<8x16xf32>
    %cst_108 = arith.constant 7.812500e-03 : f32
    %200 = vector.broadcast %cst_108 : f32 to vector<8x16xf32>
    %201 = arith.mulf %199, %200 : vector<8x16xf32>
    %cst_109 = arith.constant dense<0.000000e+00> : vector<8x32xf32>
    %202 = tpu.matmul %201, %7, %cst_109 {dimension_numbers = #tpu.dot_dimension_numbers<[1], [0], [0], [1], [0, 0, 1, 1], [], []>} : vector<8x16xf32>, vector<16x32xf32>, vector<8x32xf32> -> vector<8x32xf32>
    %cst_110 = arith.constant 0.000000e+00 : f32
    %203 = vector.broadcast %cst_110 : f32 to vector<8x32xf32>
    %204 = arith.cmpf ogt, %172, %203 : vector<8x32xf32>
    %cst_111 = arith.constant 0.000000e+00 : f32
    %205 = vector.broadcast %cst_111 : f32 to vector<8x32xf32>
    %206 = arith.select %204, %202, %205 : vector<8x32xi1>, vector<8x32xf32>
    %cst_112 = arith.constant dense<0.000000e+00> : vector<8x16xf32>
    %207 = tpu.matmul %206, %6, %cst_112 {dimension_numbers = #tpu.dot_dimension_numbers<[1], [0], [0], [1], [0, 0, 1, 1], [], []>} : vector<8x32xf32>, vector<32x16xf32>, vector<8x16xf32> -> vector<8x16xf32>
    %208 = arith.mulf %207, %207 : vector<8x16xf32>
    %cst_113 = arith.constant 8.000000e+00 : f32
    %209 = vector.broadcast %cst_113 : f32 to vector<8x16xf32>
    %210 = arith.mulf %208, %209 : vector<8x16xf32>
    %cst_114 = arith.constant dense<0.000000e+00> : vector<8xf32>
    %211 = vector.multi_reduction <add>, %210, %cst_114 [1] : vector<8x16xf32> to vector<8xf32>
    %212 = vector.shape_cast %211 : vector<8xf32> to vector<8x1xf32>
    %cst_115 = arith.constant dense<0.000000e+00> : vector<1xf32>
    %213 = vector.multi_reduction <add>, %212, %cst_115 [0] : vector<8x1xf32> to vector<1xf32>
    %214 = vector.shape_cast %213 : vector<1xf32> to vector<1x1xf32>
    %215 = math.sqrt %214 : vector<1x1xf32>
    %cst_116 = arith.constant 4.000000e+00 : f32
    %216 = vector.broadcast %cst_116 : f32 to vector<8x16xf32>
    %217 = arith.mulf %216, %207 : vector<8x16xf32>
    %218 = arith.subf %164, %217 : vector<8x16xf32>
    %c3 = arith.constant 3 : index
    %c0_117 = arith.constant 0 : index
    %c0_118 = arith.constant 0 : index
    %219 = vector.load %arg8[%c3, %c0_117, %c0_118] : memref<10x8x16xf32, #tpu.memory_space<vmem>>, vector<1x8x16xf32>
    %220 = vector.shape_cast %219 : vector<1x8x16xf32> to vector<8x16xf32>
    %221 = vector.shape_cast %218 : vector<8x16xf32> to vector<1x8x16xf32>
    tpu.vector_store %arg8[%c3, %c0_117, %c0_118], %221 {strides = array<i32>} : memref<10x8x16xf32, #tpu.memory_space<vmem>>, vector<1x8x16xf32>,
    %c3_119 = arith.constant 3 : index
    %c0_120 = arith.constant 0 : index
    %222 = vector.load %arg9[%c3_119, %c0_120] : memref<10x1xf32, #tpu.memory_space<vmem>>, vector<1x1xf32>
    tpu.vector_store %arg9[%c3_119, %c0_120], %193 {strides = array<i32>} : memref<10x1xf32, #tpu.memory_space<vmem>>, vector<1x1xf32>,
    %c3_121 = arith.constant 3 : index
    %c0_122 = arith.constant 0 : index
    %223 = vector.load %arg10[%c3_121, %c0_122] : memref<10x1xf32, #tpu.memory_space<vmem>>, vector<1x1xf32>
    tpu.vector_store %arg10[%c3_121, %c0_122], %215 {strides = array<i32>} : memref<10x1xf32, #tpu.memory_space<vmem>>, vector<1x1xf32>,
    %cst_123 = arith.constant dense<0.000000e+00> : vector<8x32xf32>
    %224 = tpu.matmul %218, %2, %cst_123 {dimension_numbers = #tpu.dot_dimension_numbers<[1], [0], [0], [1], [0, 0, 1, 1], [], []>} : vector<8x16xf32>, vector<16x32xf32>, vector<8x32xf32> -> vector<8x32xf32>
    %225 = vector.broadcast %3 : vector<1x32xf32> to vector<8x32xf32>
    %226 = arith.addf %224, %225 : vector<8x32xf32>
    %cst_124 = arith.constant 0.000000e+00 : f32
    %227 = vector.broadcast %cst_124 : f32 to vector<8x32xf32>
    %228 = arith.maximumf %226, %227 : vector<8x32xf32>
    %cst_125 = arith.constant dense<0.000000e+00> : vector<8x16xf32>
    %229 = tpu.matmul %228, %4, %cst_125 {dimension_numbers = #tpu.dot_dimension_numbers<[1], [0], [0], [1], [0, 0, 1, 1], [], []>} : vector<8x32xf32>, vector<32x16xf32>, vector<8x16xf32> -> vector<8x16xf32>
    %230 = vector.broadcast %5 : vector<1x16xf32> to vector<8x16xf32>
    %231 = arith.addf %229, %230 : vector<8x16xf32>
    %232 = arith.subf %231, %1 : vector<8x16xf32>
    %233 = math.absf %232 : vector<8x16xf32>
    %cst_126 = arith.constant 1.000000e+00 : f32
    %234 = vector.broadcast %cst_126 : f32 to vector<8x16xf32>
    %235 = arith.cmpf olt, %233, %234 : vector<8x16xf32>
    %cst_127 = arith.constant 5.000000e-01 : f32
    %236 = vector.broadcast %cst_127 : f32 to vector<8x16xf32>
    %237 = arith.mulf %236, %232 : vector<8x16xf32>
    %238 = arith.mulf %237, %232 : vector<8x16xf32>
    %cst_128 = arith.constant 5.000000e-01 : f32
    %239 = vector.broadcast %cst_128 : f32 to vector<8x16xf32>
    %240 = arith.subf %233, %239 : vector<8x16xf32>
    %241 = arith.select %235, %238, %240 : vector<8x16xi1>, vector<8x16xf32>
    %cst_129 = arith.constant 7.812500e-03 : f32
    %242 = vector.broadcast %cst_129 : f32 to vector<8x16xf32>
    %243 = arith.mulf %241, %242 : vector<8x16xf32>
    %cst_130 = arith.constant dense<0.000000e+00> : vector<8xf32>
    %244 = vector.multi_reduction <add>, %243, %cst_130 [1] : vector<8x16xf32> to vector<8xf32>
    %245 = vector.shape_cast %244 : vector<8xf32> to vector<8x1xf32>
    %cst_131 = arith.constant dense<0.000000e+00> : vector<1xf32>
    %246 = vector.multi_reduction <add>, %245, %cst_131 [0] : vector<8x1xf32> to vector<1xf32>
    %247 = vector.shape_cast %246 : vector<1xf32> to vector<1x1xf32>
    %cst_132 = arith.constant 0.000000e+00 : f32
    %248 = vector.broadcast %cst_132 : f32 to vector<8x16xf32>
    %249 = arith.cmpf ogt, %232, %248 : vector<8x16xf32>
    %cst_133 = arith.constant 1.000000e+00 : f32
    %cst_134 = arith.constant -1.000000e+00 : f32
    %250 = vector.broadcast %cst_133 : f32 to vector<8x16xf32>
    %251 = vector.broadcast %cst_134 : f32 to vector<8x16xf32>
    %252 = arith.select %249, %250, %251 : vector<8x16xi1>, vector<8x16xf32>
    %253 = arith.select %235, %232, %252 : vector<8x16xi1>, vector<8x16xf32>
    %cst_135 = arith.constant 7.812500e-03 : f32
    %254 = vector.broadcast %cst_135 : f32 to vector<8x16xf32>
    %255 = arith.mulf %253, %254 : vector<8x16xf32>
    %cst_136 = arith.constant dense<0.000000e+00> : vector<8x32xf32>
    %256 = tpu.matmul %255, %7, %cst_136 {dimension_numbers = #tpu.dot_dimension_numbers<[1], [0], [0], [1], [0, 0, 1, 1], [], []>} : vector<8x16xf32>, vector<16x32xf32>, vector<8x32xf32> -> vector<8x32xf32>
    %cst_137 = arith.constant 0.000000e+00 : f32
    %257 = vector.broadcast %cst_137 : f32 to vector<8x32xf32>
    %258 = arith.cmpf ogt, %226, %257 : vector<8x32xf32>
    %cst_138 = arith.constant 0.000000e+00 : f32
    %259 = vector.broadcast %cst_138 : f32 to vector<8x32xf32>
    %260 = arith.select %258, %256, %259 : vector<8x32xi1>, vector<8x32xf32>
    %cst_139 = arith.constant dense<0.000000e+00> : vector<8x16xf32>
    %261 = tpu.matmul %260, %6, %cst_139 {dimension_numbers = #tpu.dot_dimension_numbers<[1], [0], [0], [1], [0, 0, 1, 1], [], []>} : vector<8x32xf32>, vector<32x16xf32>, vector<8x16xf32> -> vector<8x16xf32>
    %262 = arith.mulf %261, %261 : vector<8x16xf32>
    %cst_140 = arith.constant 8.000000e+00 : f32
    %263 = vector.broadcast %cst_140 : f32 to vector<8x16xf32>
    %264 = arith.mulf %262, %263 : vector<8x16xf32>
    %cst_141 = arith.constant dense<0.000000e+00> : vector<8xf32>
    %265 = vector.multi_reduction <add>, %264, %cst_141 [1] : vector<8x16xf32> to vector<8xf32>
    %266 = vector.shape_cast %265 : vector<8xf32> to vector<8x1xf32>
    %cst_142 = arith.constant dense<0.000000e+00> : vector<1xf32>
    %267 = vector.multi_reduction <add>, %266, %cst_142 [0] : vector<8x1xf32> to vector<1xf32>
    %268 = vector.shape_cast %267 : vector<1xf32> to vector<1x1xf32>
    %269 = math.sqrt %268 : vector<1x1xf32>
    %cst_143 = arith.constant 4.000000e+00 : f32
    %270 = vector.broadcast %cst_143 : f32 to vector<8x16xf32>
    %271 = arith.mulf %270, %261 : vector<8x16xf32>
    %272 = arith.subf %218, %271 : vector<8x16xf32>
    %c4 = arith.constant 4 : index
    %c0_144 = arith.constant 0 : index
    %c0_145 = arith.constant 0 : index
    %273 = vector.load %arg8[%c4, %c0_144, %c0_145] : memref<10x8x16xf32, #tpu.memory_space<vmem>>, vector<1x8x16xf32>
    %274 = vector.shape_cast %273 : vector<1x8x16xf32> to vector<8x16xf32>
    %275 = vector.shape_cast %272 : vector<8x16xf32> to vector<1x8x16xf32>
    tpu.vector_store %arg8[%c4, %c0_144, %c0_145], %275 {strides = array<i32>} : memref<10x8x16xf32, #tpu.memory_space<vmem>>, vector<1x8x16xf32>,
    %c4_146 = arith.constant 4 : index
    %c0_147 = arith.constant 0 : index
    %276 = vector.load %arg9[%c4_146, %c0_147] : memref<10x1xf32, #tpu.memory_space<vmem>>, vector<1x1xf32>
    tpu.vector_store %arg9[%c4_146, %c0_147], %247 {strides = array<i32>} : memref<10x1xf32, #tpu.memory_space<vmem>>, vector<1x1xf32>,
    %c4_148 = arith.constant 4 : index
    %c0_149 = arith.constant 0 : index
    %277 = vector.load %arg10[%c4_148, %c0_149] : memref<10x1xf32, #tpu.memory_space<vmem>>, vector<1x1xf32>
    tpu.vector_store %arg10[%c4_148, %c0_149], %269 {strides = array<i32>} : memref<10x1xf32, #tpu.memory_space<vmem>>, vector<1x1xf32>,
    %cst_150 = arith.constant dense<0.000000e+00> : vector<8x32xf32>
    %278 = tpu.matmul %272, %2, %cst_150 {dimension_numbers = #tpu.dot_dimension_numbers<[1], [0], [0], [1], [0, 0, 1, 1], [], []>} : vector<8x16xf32>, vector<16x32xf32>, vector<8x32xf32> -> vector<8x32xf32>
    %279 = vector.broadcast %3 : vector<1x32xf32> to vector<8x32xf32>
    %280 = arith.addf %278, %279 : vector<8x32xf32>
    %cst_151 = arith.constant 0.000000e+00 : f32
    %281 = vector.broadcast %cst_151 : f32 to vector<8x32xf32>
    %282 = arith.maximumf %280, %281 : vector<8x32xf32>
    %cst_152 = arith.constant dense<0.000000e+00> : vector<8x16xf32>
    %283 = tpu.matmul %282, %4, %cst_152 {dimension_numbers = #tpu.dot_dimension_numbers<[1], [0], [0], [1], [0, 0, 1, 1], [], []>} : vector<8x32xf32>, vector<32x16xf32>, vector<8x16xf32> -> vector<8x16xf32>
    %284 = vector.broadcast %5 : vector<1x16xf32> to vector<8x16xf32>
    %285 = arith.addf %283, %284 : vector<8x16xf32>
    %286 = arith.subf %285, %1 : vector<8x16xf32>
    %287 = math.absf %286 : vector<8x16xf32>
    %cst_153 = arith.constant 1.000000e+00 : f32
    %288 = vector.broadcast %cst_153 : f32 to vector<8x16xf32>
    %289 = arith.cmpf olt, %287, %288 : vector<8x16xf32>
    %cst_154 = arith.constant 5.000000e-01 : f32
    %290 = vector.broadcast %cst_154 : f32 to vector<8x16xf32>
    %291 = arith.mulf %290, %286 : vector<8x16xf32>
    %292 = arith.mulf %291, %286 : vector<8x16xf32>
    %cst_155 = arith.constant 5.000000e-01 : f32
    %293 = vector.broadcast %cst_155 : f32 to vector<8x16xf32>
    %294 = arith.subf %287, %293 : vector<8x16xf32>
    %295 = arith.select %289, %292, %294 : vector<8x16xi1>, vector<8x16xf32>
    %cst_156 = arith.constant 7.812500e-03 : f32
    %296 = vector.broadcast %cst_156 : f32 to vector<8x16xf32>
    %297 = arith.mulf %295, %296 : vector<8x16xf32>
    %cst_157 = arith.constant dense<0.000000e+00> : vector<8xf32>
    %298 = vector.multi_reduction <add>, %297, %cst_157 [1] : vector<8x16xf32> to vector<8xf32>
    %299 = vector.shape_cast %298 : vector<8xf32> to vector<8x1xf32>
    %cst_158 = arith.constant dense<0.000000e+00> : vector<1xf32>
    %300 = vector.multi_reduction <add>, %299, %cst_158 [0] : vector<8x1xf32> to vector<1xf32>
    %301 = vector.shape_cast %300 : vector<1xf32> to vector<1x1xf32>
    %cst_159 = arith.constant 0.000000e+00 : f32
    %302 = vector.broadcast %cst_159 : f32 to vector<8x16xf32>
    %303 = arith.cmpf ogt, %286, %302 : vector<8x16xf32>
    %cst_160 = arith.constant 1.000000e+00 : f32
    %cst_161 = arith.constant -1.000000e+00 : f32
    %304 = vector.broadcast %cst_160 : f32 to vector<8x16xf32>
    %305 = vector.broadcast %cst_161 : f32 to vector<8x16xf32>
    %306 = arith.select %303, %304, %305 : vector<8x16xi1>, vector<8x16xf32>
    %307 = arith.select %289, %286, %306 : vector<8x16xi1>, vector<8x16xf32>
    %cst_162 = arith.constant 7.812500e-03 : f32
    %308 = vector.broadcast %cst_162 : f32 to vector<8x16xf32>
    %309 = arith.mulf %307, %308 : vector<8x16xf32>
    %cst_163 = arith.constant dense<0.000000e+00> : vector<8x32xf32>
    %310 = tpu.matmul %309, %7, %cst_163 {dimension_numbers = #tpu.dot_dimension_numbers<[1], [0], [0], [1], [0, 0, 1, 1], [], []>} : vector<8x16xf32>, vector<16x32xf32>, vector<8x32xf32> -> vector<8x32xf32>
    %cst_164 = arith.constant 0.000000e+00 : f32
    %311 = vector.broadcast %cst_164 : f32 to vector<8x32xf32>
    %312 = arith.cmpf ogt, %280, %311 : vector<8x32xf32>
    %cst_165 = arith.constant 0.000000e+00 : f32
    %313 = vector.broadcast %cst_165 : f32 to vector<8x32xf32>
    %314 = arith.select %312, %310, %313 : vector<8x32xi1>, vector<8x32xf32>
    %cst_166 = arith.constant dense<0.000000e+00> : vector<8x16xf32>
    %315 = tpu.matmul %314, %6, %cst_166 {dimension_numbers = #tpu.dot_dimension_numbers<[1], [0], [0], [1], [0, 0, 1, 1], [], []>} : vector<8x32xf32>, vector<32x16xf32>, vector<8x16xf32> -> vector<8x16xf32>
    %316 = arith.mulf %315, %315 : vector<8x16xf32>
    %cst_167 = arith.constant 8.000000e+00 : f32
    %317 = vector.broadcast %cst_167 : f32 to vector<8x16xf32>
    %318 = arith.mulf %316, %317 : vector<8x16xf32>
    %cst_168 = arith.constant dense<0.000000e+00> : vector<8xf32>
    %319 = vector.multi_reduction <add>, %318, %cst_168 [1] : vector<8x16xf32> to vector<8xf32>
    %320 = vector.shape_cast %319 : vector<8xf32> to vector<8x1xf32>
    %cst_169 = arith.constant dense<0.000000e+00> : vector<1xf32>
    %321 = vector.multi_reduction <add>, %320, %cst_169 [0] : vector<8x1xf32> to vector<1xf32>
    %322 = vector.shape_cast %321 : vector<1xf32> to vector<1x1xf32>
    %323 = math.sqrt %322 : vector<1x1xf32>
    %cst_170 = arith.constant 4.000000e+00 : f32
    %324 = vector.broadcast %cst_170 : f32 to vector<8x16xf32>
    %325 = arith.mulf %324, %315 : vector<8x16xf32>
    %326 = arith.subf %272, %325 : vector<8x16xf32>
    %c5 = arith.constant 5 : index
    %c0_171 = arith.constant 0 : index
    %c0_172 = arith.constant 0 : index
    %327 = vector.load %arg8[%c5, %c0_171, %c0_172] : memref<10x8x16xf32, #tpu.memory_space<vmem>>, vector<1x8x16xf32>
    %328 = vector.shape_cast %327 : vector<1x8x16xf32> to vector<8x16xf32>
    %329 = vector.shape_cast %326 : vector<8x16xf32> to vector<1x8x16xf32>
    tpu.vector_store %arg8[%c5, %c0_171, %c0_172], %329 {strides = array<i32>} : memref<10x8x16xf32, #tpu.memory_space<vmem>>, vector<1x8x16xf32>,
    %c5_173 = arith.constant 5 : index
    %c0_174 = arith.constant 0 : index
    %330 = vector.load %arg9[%c5_173, %c0_174] : memref<10x1xf32, #tpu.memory_space<vmem>>, vector<1x1xf32>
    tpu.vector_store %arg9[%c5_173, %c0_174], %301 {strides = array<i32>} : memref<10x1xf32, #tpu.memory_space<vmem>>, vector<1x1xf32>,
    %c5_175 = arith.constant 5 : index
    %c0_176 = arith.constant 0 : index
    %331 = vector.load %arg10[%c5_175, %c0_176] : memref<10x1xf32, #tpu.memory_space<vmem>>, vector<1x1xf32>
    tpu.vector_store %arg10[%c5_175, %c0_176], %323 {strides = array<i32>} : memref<10x1xf32, #tpu.memory_space<vmem>>, vector<1x1xf32>,
    %cst_177 = arith.constant dense<0.000000e+00> : vector<8x32xf32>
    %332 = tpu.matmul %326, %2, %cst_177 {dimension_numbers = #tpu.dot_dimension_numbers<[1], [0], [0], [1], [0, 0, 1, 1], [], []>} : vector<8x16xf32>, vector<16x32xf32>, vector<8x32xf32> -> vector<8x32xf32>
    %333 = vector.broadcast %3 : vector<1x32xf32> to vector<8x32xf32>
    %334 = arith.addf %332, %333 : vector<8x32xf32>
    %cst_178 = arith.constant 0.000000e+00 : f32
    %335 = vector.broadcast %cst_178 : f32 to vector<8x32xf32>
    %336 = arith.maximumf %334, %335 : vector<8x32xf32>
    %cst_179 = arith.constant dense<0.000000e+00> : vector<8x16xf32>
    %337 = tpu.matmul %336, %4, %cst_179 {dimension_numbers = #tpu.dot_dimension_numbers<[1], [0], [0], [1], [0, 0, 1, 1], [], []>} : vector<8x32xf32>, vector<32x16xf32>, vector<8x16xf32> -> vector<8x16xf32>
    %338 = vector.broadcast %5 : vector<1x16xf32> to vector<8x16xf32>
    %339 = arith.addf %337, %338 : vector<8x16xf32>
    %340 = arith.subf %339, %1 : vector<8x16xf32>
    %341 = math.absf %340 : vector<8x16xf32>
    %cst_180 = arith.constant 1.000000e+00 : f32
    %342 = vector.broadcast %cst_180 : f32 to vector<8x16xf32>
    %343 = arith.cmpf olt, %341, %342 : vector<8x16xf32>
    %cst_181 = arith.constant 5.000000e-01 : f32
    %344 = vector.broadcast %cst_181 : f32 to vector<8x16xf32>
    %345 = arith.mulf %344, %340 : vector<8x16xf32>
    %346 = arith.mulf %345, %340 : vector<8x16xf32>
    %cst_182 = arith.constant 5.000000e-01 : f32
    %347 = vector.broadcast %cst_182 : f32 to vector<8x16xf32>
    %348 = arith.subf %341, %347 : vector<8x16xf32>
    %349 = arith.select %343, %346, %348 : vector<8x16xi1>, vector<8x16xf32>
    %cst_183 = arith.constant 7.812500e-03 : f32
    %350 = vector.broadcast %cst_183 : f32 to vector<8x16xf32>
    %351 = arith.mulf %349, %350 : vector<8x16xf32>
    %cst_184 = arith.constant dense<0.000000e+00> : vector<8xf32>
    %352 = vector.multi_reduction <add>, %351, %cst_184 [1] : vector<8x16xf32> to vector<8xf32>
    %353 = vector.shape_cast %352 : vector<8xf32> to vector<8x1xf32>
    %cst_185 = arith.constant dense<0.000000e+00> : vector<1xf32>
    %354 = vector.multi_reduction <add>, %353, %cst_185 [0] : vector<8x1xf32> to vector<1xf32>
    %355 = vector.shape_cast %354 : vector<1xf32> to vector<1x1xf32>
    %cst_186 = arith.constant 0.000000e+00 : f32
    %356 = vector.broadcast %cst_186 : f32 to vector<8x16xf32>
    %357 = arith.cmpf ogt, %340, %356 : vector<8x16xf32>
    %cst_187 = arith.constant 1.000000e+00 : f32
    %cst_188 = arith.constant -1.000000e+00 : f32
    %358 = vector.broadcast %cst_187 : f32 to vector<8x16xf32>
    %359 = vector.broadcast %cst_188 : f32 to vector<8x16xf32>
    %360 = arith.select %357, %358, %359 : vector<8x16xi1>, vector<8x16xf32>
    %361 = arith.select %343, %340, %360 : vector<8x16xi1>, vector<8x16xf32>
    %cst_189 = arith.constant 7.812500e-03 : f32
    %362 = vector.broadcast %cst_189 : f32 to vector<8x16xf32>
    %363 = arith.mulf %361, %362 : vector<8x16xf32>
    %cst_190 = arith.constant dense<0.000000e+00> : vector<8x32xf32>
    %364 = tpu.matmul %363, %7, %cst_190 {dimension_numbers = #tpu.dot_dimension_numbers<[1], [0], [0], [1], [0, 0, 1, 1], [], []>} : vector<8x16xf32>, vector<16x32xf32>, vector<8x32xf32> -> vector<8x32xf32>
    %cst_191 = arith.constant 0.000000e+00 : f32
    %365 = vector.broadcast %cst_191 : f32 to vector<8x32xf32>
    %366 = arith.cmpf ogt, %334, %365 : vector<8x32xf32>
    %cst_192 = arith.constant 0.000000e+00 : f32
    %367 = vector.broadcast %cst_192 : f32 to vector<8x32xf32>
    %368 = arith.select %366, %364, %367 : vector<8x32xi1>, vector<8x32xf32>
    %cst_193 = arith.constant dense<0.000000e+00> : vector<8x16xf32>
    %369 = tpu.matmul %368, %6, %cst_193 {dimension_numbers = #tpu.dot_dimension_numbers<[1], [0], [0], [1], [0, 0, 1, 1], [], []>} : vector<8x32xf32>, vector<32x16xf32>, vector<8x16xf32> -> vector<8x16xf32>
    %370 = arith.mulf %369, %369 : vector<8x16xf32>
    %cst_194 = arith.constant 8.000000e+00 : f32
    %371 = vector.broadcast %cst_194 : f32 to vector<8x16xf32>
    %372 = arith.mulf %370, %371 : vector<8x16xf32>
    %cst_195 = arith.constant dense<0.000000e+00> : vector<8xf32>
    %373 = vector.multi_reduction <add>, %372, %cst_195 [1] : vector<8x16xf32> to vector<8xf32>
    %374 = vector.shape_cast %373 : vector<8xf32> to vector<8x1xf32>
    %cst_196 = arith.constant dense<0.000000e+00> : vector<1xf32>
    %375 = vector.multi_reduction <add>, %374, %cst_196 [0] : vector<8x1xf32> to vector<1xf32>
    %376 = vector.shape_cast %375 : vector<1xf32> to vector<1x1xf32>
    %377 = math.sqrt %376 : vector<1x1xf32>
    %cst_197 = arith.constant 4.000000e+00 : f32
    %378 = vector.broadcast %cst_197 : f32 to vector<8x16xf32>
    %379 = arith.mulf %378, %369 : vector<8x16xf32>
    %380 = arith.subf %326, %379 : vector<8x16xf32>
    %c6 = arith.constant 6 : index
    %c0_198 = arith.constant 0 : index
    %c0_199 = arith.constant 0 : index
    %381 = vector.load %arg8[%c6, %c0_198, %c0_199] : memref<10x8x16xf32, #tpu.memory_space<vmem>>, vector<1x8x16xf32>
    %382 = vector.shape_cast %381 : vector<1x8x16xf32> to vector<8x16xf32>
    %383 = vector.shape_cast %380 : vector<8x16xf32> to vector<1x8x16xf32>
    tpu.vector_store %arg8[%c6, %c0_198, %c0_199], %383 {strides = array<i32>} : memref<10x8x16xf32, #tpu.memory_space<vmem>>, vector<1x8x16xf32>,
    %c6_200 = arith.constant 6 : index
    %c0_201 = arith.constant 0 : index
    %384 = vector.load %arg9[%c6_200, %c0_201] : memref<10x1xf32, #tpu.memory_space<vmem>>, vector<1x1xf32>
    tpu.vector_store %arg9[%c6_200, %c0_201], %355 {strides = array<i32>} : memref<10x1xf32, #tpu.memory_space<vmem>>, vector<1x1xf32>,
    %c6_202 = arith.constant 6 : index
    %c0_203 = arith.constant 0 : index
    %385 = vector.load %arg10[%c6_202, %c0_203] : memref<10x1xf32, #tpu.memory_space<vmem>>, vector<1x1xf32>
    tpu.vector_store %arg10[%c6_202, %c0_203], %377 {strides = array<i32>} : memref<10x1xf32, #tpu.memory_space<vmem>>, vector<1x1xf32>,
    %cst_204 = arith.constant dense<0.000000e+00> : vector<8x32xf32>
    %386 = tpu.matmul %380, %2, %cst_204 {dimension_numbers = #tpu.dot_dimension_numbers<[1], [0], [0], [1], [0, 0, 1, 1], [], []>} : vector<8x16xf32>, vector<16x32xf32>, vector<8x32xf32> -> vector<8x32xf32>
    %387 = vector.broadcast %3 : vector<1x32xf32> to vector<8x32xf32>
    %388 = arith.addf %386, %387 : vector<8x32xf32>
    %cst_205 = arith.constant 0.000000e+00 : f32
    %389 = vector.broadcast %cst_205 : f32 to vector<8x32xf32>
    %390 = arith.maximumf %388, %389 : vector<8x32xf32>
    %cst_206 = arith.constant dense<0.000000e+00> : vector<8x16xf32>
    %391 = tpu.matmul %390, %4, %cst_206 {dimension_numbers = #tpu.dot_dimension_numbers<[1], [0], [0], [1], [0, 0, 1, 1], [], []>} : vector<8x32xf32>, vector<32x16xf32>, vector<8x16xf32> -> vector<8x16xf32>
    %392 = vector.broadcast %5 : vector<1x16xf32> to vector<8x16xf32>
    %393 = arith.addf %391, %392 : vector<8x16xf32>
    %394 = arith.subf %393, %1 : vector<8x16xf32>
    %395 = math.absf %394 : vector<8x16xf32>
    %cst_207 = arith.constant 1.000000e+00 : f32
    %396 = vector.broadcast %cst_207 : f32 to vector<8x16xf32>
    %397 = arith.cmpf olt, %395, %396 : vector<8x16xf32>
    %cst_208 = arith.constant 5.000000e-01 : f32
    %398 = vector.broadcast %cst_208 : f32 to vector<8x16xf32>
    %399 = arith.mulf %398, %394 : vector<8x16xf32>
    %400 = arith.mulf %399, %394 : vector<8x16xf32>
    %cst_209 = arith.constant 5.000000e-01 : f32
    %401 = vector.broadcast %cst_209 : f32 to vector<8x16xf32>
    %402 = arith.subf %395, %401 : vector<8x16xf32>
    %403 = arith.select %397, %400, %402 : vector<8x16xi1>, vector<8x16xf32>
    %cst_210 = arith.constant 7.812500e-03 : f32
    %404 = vector.broadcast %cst_210 : f32 to vector<8x16xf32>
    %405 = arith.mulf %403, %404 : vector<8x16xf32>
    %cst_211 = arith.constant dense<0.000000e+00> : vector<8xf32>
    %406 = vector.multi_reduction <add>, %405, %cst_211 [1] : vector<8x16xf32> to vector<8xf32>
    %407 = vector.shape_cast %406 : vector<8xf32> to vector<8x1xf32>
    %cst_212 = arith.constant dense<0.000000e+00> : vector<1xf32>
    %408 = vector.multi_reduction <add>, %407, %cst_212 [0] : vector<8x1xf32> to vector<1xf32>
    %409 = vector.shape_cast %408 : vector<1xf32> to vector<1x1xf32>
    %cst_213 = arith.constant 0.000000e+00 : f32
    %410 = vector.broadcast %cst_213 : f32 to vector<8x16xf32>
    %411 = arith.cmpf ogt, %394, %410 : vector<8x16xf32>
    %cst_214 = arith.constant 1.000000e+00 : f32
    %cst_215 = arith.constant -1.000000e+00 : f32
    %412 = vector.broadcast %cst_214 : f32 to vector<8x16xf32>
    %413 = vector.broadcast %cst_215 : f32 to vector<8x16xf32>
    %414 = arith.select %411, %412, %413 : vector<8x16xi1>, vector<8x16xf32>
    %415 = arith.select %397, %394, %414 : vector<8x16xi1>, vector<8x16xf32>
    %cst_216 = arith.constant 7.812500e-03 : f32
    %416 = vector.broadcast %cst_216 : f32 to vector<8x16xf32>
    %417 = arith.mulf %415, %416 : vector<8x16xf32>
    %cst_217 = arith.constant dense<0.000000e+00> : vector<8x32xf32>
    %418 = tpu.matmul %417, %7, %cst_217 {dimension_numbers = #tpu.dot_dimension_numbers<[1], [0], [0], [1], [0, 0, 1, 1], [], []>} : vector<8x16xf32>, vector<16x32xf32>, vector<8x32xf32> -> vector<8x32xf32>
    %cst_218 = arith.constant 0.000000e+00 : f32
    %419 = vector.broadcast %cst_218 : f32 to vector<8x32xf32>
    %420 = arith.cmpf ogt, %388, %419 : vector<8x32xf32>
    %cst_219 = arith.constant 0.000000e+00 : f32
    %421 = vector.broadcast %cst_219 : f32 to vector<8x32xf32>
    %422 = arith.select %420, %418, %421 : vector<8x32xi1>, vector<8x32xf32>
    %cst_220 = arith.constant dense<0.000000e+00> : vector<8x16xf32>
    %423 = tpu.matmul %422, %6, %cst_220 {dimension_numbers = #tpu.dot_dimension_numbers<[1], [0], [0], [1], [0, 0, 1, 1], [], []>} : vector<8x32xf32>, vector<32x16xf32>, vector<8x16xf32> -> vector<8x16xf32>
    %424 = arith.mulf %423, %423 : vector<8x16xf32>
    %cst_221 = arith.constant 8.000000e+00 : f32
    %425 = vector.broadcast %cst_221 : f32 to vector<8x16xf32>
    %426 = arith.mulf %424, %425 : vector<8x16xf32>
    %cst_222 = arith.constant dense<0.000000e+00> : vector<8xf32>
    %427 = vector.multi_reduction <add>, %426, %cst_222 [1] : vector<8x16xf32> to vector<8xf32>
    %428 = vector.shape_cast %427 : vector<8xf32> to vector<8x1xf32>
    %cst_223 = arith.constant dense<0.000000e+00> : vector<1xf32>
    %429 = vector.multi_reduction <add>, %428, %cst_223 [0] : vector<8x1xf32> to vector<1xf32>
    %430 = vector.shape_cast %429 : vector<1xf32> to vector<1x1xf32>
    %431 = math.sqrt %430 : vector<1x1xf32>
    %cst_224 = arith.constant 4.000000e+00 : f32
    %432 = vector.broadcast %cst_224 : f32 to vector<8x16xf32>
    %433 = arith.mulf %432, %423 : vector<8x16xf32>
    %434 = arith.subf %380, %433 : vector<8x16xf32>
    %c7 = arith.constant 7 : index
    %c0_225 = arith.constant 0 : index
    %c0_226 = arith.constant 0 : index
    %435 = vector.load %arg8[%c7, %c0_225, %c0_226] : memref<10x8x16xf32, #tpu.memory_space<vmem>>, vector<1x8x16xf32>
    %436 = vector.shape_cast %435 : vector<1x8x16xf32> to vector<8x16xf32>
    %437 = vector.shape_cast %434 : vector<8x16xf32> to vector<1x8x16xf32>
    tpu.vector_store %arg8[%c7, %c0_225, %c0_226], %437 {strides = array<i32>} : memref<10x8x16xf32, #tpu.memory_space<vmem>>, vector<1x8x16xf32>,
    %c7_227 = arith.constant 7 : index
    %c0_228 = arith.constant 0 : index
    %438 = vector.load %arg9[%c7_227, %c0_228] : memref<10x1xf32, #tpu.memory_space<vmem>>, vector<1x1xf32>
    tpu.vector_store %arg9[%c7_227, %c0_228], %409 {strides = array<i32>} : memref<10x1xf32, #tpu.memory_space<vmem>>, vector<1x1xf32>,
    %c7_229 = arith.constant 7 : index
    %c0_230 = arith.constant 0 : index
    %439 = vector.load %arg10[%c7_229, %c0_230] : memref<10x1xf32, #tpu.memory_space<vmem>>, vector<1x1xf32>
    tpu.vector_store %arg10[%c7_229, %c0_230], %431 {strides = array<i32>} : memref<10x1xf32, #tpu.memory_space<vmem>>, vector<1x1xf32>,
    %cst_231 = arith.constant dense<0.000000e+00> : vector<8x32xf32>
    %440 = tpu.matmul %434, %2, %cst_231 {dimension_numbers = #tpu.dot_dimension_numbers<[1], [0], [0], [1], [0, 0, 1, 1], [], []>} : vector<8x16xf32>, vector<16x32xf32>, vector<8x32xf32> -> vector<8x32xf32>
    %441 = vector.broadcast %3 : vector<1x32xf32> to vector<8x32xf32>
    %442 = arith.addf %440, %441 : vector<8x32xf32>
    %cst_232 = arith.constant 0.000000e+00 : f32
    %443 = vector.broadcast %cst_232 : f32 to vector<8x32xf32>
    %444 = arith.maximumf %442, %443 : vector<8x32xf32>
    %cst_233 = arith.constant dense<0.000000e+00> : vector<8x16xf32>
    %445 = tpu.matmul %444, %4, %cst_233 {dimension_numbers = #tpu.dot_dimension_numbers<[1], [0], [0], [1], [0, 0, 1, 1], [], []>} : vector<8x32xf32>, vector<32x16xf32>, vector<8x16xf32> -> vector<8x16xf32>
    %446 = vector.broadcast %5 : vector<1x16xf32> to vector<8x16xf32>
    %447 = arith.addf %445, %446 : vector<8x16xf32>
    %448 = arith.subf %447, %1 : vector<8x16xf32>
    %449 = math.absf %448 : vector<8x16xf32>
    %cst_234 = arith.constant 1.000000e+00 : f32
    %450 = vector.broadcast %cst_234 : f32 to vector<8x16xf32>
    %451 = arith.cmpf olt, %449, %450 : vector<8x16xf32>
    %cst_235 = arith.constant 5.000000e-01 : f32
    %452 = vector.broadcast %cst_235 : f32 to vector<8x16xf32>
    %453 = arith.mulf %452, %448 : vector<8x16xf32>
    %454 = arith.mulf %453, %448 : vector<8x16xf32>
    %cst_236 = arith.constant 5.000000e-01 : f32
    %455 = vector.broadcast %cst_236 : f32 to vector<8x16xf32>
    %456 = arith.subf %449, %455 : vector<8x16xf32>
    %457 = arith.select %451, %454, %456 : vector<8x16xi1>, vector<8x16xf32>
    %cst_237 = arith.constant 7.812500e-03 : f32
    %458 = vector.broadcast %cst_237 : f32 to vector<8x16xf32>
    %459 = arith.mulf %457, %458 : vector<8x16xf32>
    %cst_238 = arith.constant dense<0.000000e+00> : vector<8xf32>
    %460 = vector.multi_reduction <add>, %459, %cst_238 [1] : vector<8x16xf32> to vector<8xf32>
    %461 = vector.shape_cast %460 : vector<8xf32> to vector<8x1xf32>
    %cst_239 = arith.constant dense<0.000000e+00> : vector<1xf32>
    %462 = vector.multi_reduction <add>, %461, %cst_239 [0] : vector<8x1xf32> to vector<1xf32>
    %463 = vector.shape_cast %462 : vector<1xf32> to vector<1x1xf32>
    %cst_240 = arith.constant 0.000000e+00 : f32
    %464 = vector.broadcast %cst_240 : f32 to vector<8x16xf32>
    %465 = arith.cmpf ogt, %448, %464 : vector<8x16xf32>
    %cst_241 = arith.constant 1.000000e+00 : f32
    %cst_242 = arith.constant -1.000000e+00 : f32
    %466 = vector.broadcast %cst_241 : f32 to vector<8x16xf32>
    %467 = vector.broadcast %cst_242 : f32 to vector<8x16xf32>
    %468 = arith.select %465, %466, %467 : vector<8x16xi1>, vector<8x16xf32>
    %469 = arith.select %451, %448, %468 : vector<8x16xi1>, vector<8x16xf32>
    %cst_243 = arith.constant 7.812500e-03 : f32
    %470 = vector.broadcast %cst_243 : f32 to vector<8x16xf32>
    %471 = arith.mulf %469, %470 : vector<8x16xf32>
    %cst_244 = arith.constant dense<0.000000e+00> : vector<8x32xf32>
    %472 = tpu.matmul %471, %7, %cst_244 {dimension_numbers = #tpu.dot_dimension_numbers<[1], [0], [0], [1], [0, 0, 1, 1], [], []>} : vector<8x16xf32>, vector<16x32xf32>, vector<8x32xf32> -> vector<8x32xf32>
    %cst_245 = arith.constant 0.000000e+00 : f32
    %473 = vector.broadcast %cst_245 : f32 to vector<8x32xf32>
    %474 = arith.cmpf ogt, %442, %473 : vector<8x32xf32>
    %cst_246 = arith.constant 0.000000e+00 : f32
    %475 = vector.broadcast %cst_246 : f32 to vector<8x32xf32>
    %476 = arith.select %474, %472, %475 : vector<8x32xi1>, vector<8x32xf32>
    %cst_247 = arith.constant dense<0.000000e+00> : vector<8x16xf32>
    %477 = tpu.matmul %476, %6, %cst_247 {dimension_numbers = #tpu.dot_dimension_numbers<[1], [0], [0], [1], [0, 0, 1, 1], [], []>} : vector<8x32xf32>, vector<32x16xf32>, vector<8x16xf32> -> vector<8x16xf32>
    %478 = arith.mulf %477, %477 : vector<8x16xf32>
    %cst_248 = arith.constant 8.000000e+00 : f32
    %479 = vector.broadcast %cst_248 : f32 to vector<8x16xf32>
    %480 = arith.mulf %478, %479 : vector<8x16xf32>
    %cst_249 = arith.constant dense<0.000000e+00> : vector<8xf32>
    %481 = vector.multi_reduction <add>, %480, %cst_249 [1] : vector<8x16xf32> to vector<8xf32>
    %482 = vector.shape_cast %481 : vector<8xf32> to vector<8x1xf32>
    %cst_250 = arith.constant dense<0.000000e+00> : vector<1xf32>
    %483 = vector.multi_reduction <add>, %482, %cst_250 [0] : vector<8x1xf32> to vector<1xf32>
    %484 = vector.shape_cast %483 : vector<1xf32> to vector<1x1xf32>
    %485 = math.sqrt %484 : vector<1x1xf32>
    %cst_251 = arith.constant 4.000000e+00 : f32
    %486 = vector.broadcast %cst_251 : f32 to vector<8x16xf32>
    %487 = arith.mulf %486, %477 : vector<8x16xf32>
    %488 = arith.subf %434, %487 : vector<8x16xf32>
    %c8 = arith.constant 8 : index
    %c0_252 = arith.constant 0 : index
    %c0_253 = arith.constant 0 : index
    %489 = vector.load %arg8[%c8, %c0_252, %c0_253] : memref<10x8x16xf32, #tpu.memory_space<vmem>>, vector<1x8x16xf32>
    %490 = vector.shape_cast %489 : vector<1x8x16xf32> to vector<8x16xf32>
    %491 = vector.shape_cast %488 : vector<8x16xf32> to vector<1x8x16xf32>
    tpu.vector_store %arg8[%c8, %c0_252, %c0_253], %491 {strides = array<i32>} : memref<10x8x16xf32, #tpu.memory_space<vmem>>, vector<1x8x16xf32>,
    %c8_254 = arith.constant 8 : index
    %c0_255 = arith.constant 0 : index
    %492 = vector.load %arg9[%c8_254, %c0_255] : memref<10x1xf32, #tpu.memory_space<vmem>>, vector<1x1xf32>
    tpu.vector_store %arg9[%c8_254, %c0_255], %463 {strides = array<i32>} : memref<10x1xf32, #tpu.memory_space<vmem>>, vector<1x1xf32>,
    %c8_256 = arith.constant 8 : index
    %c0_257 = arith.constant 0 : index
    %493 = vector.load %arg10[%c8_256, %c0_257] : memref<10x1xf32, #tpu.memory_space<vmem>>, vector<1x1xf32>
    tpu.vector_store %arg10[%c8_256, %c0_257], %485 {strides = array<i32>} : memref<10x1xf32, #tpu.memory_space<vmem>>, vector<1x1xf32>,
    %cst_258 = arith.constant dense<0.000000e+00> : vector<8x32xf32>
    %494 = tpu.matmul %488, %2, %cst_258 {dimension_numbers = #tpu.dot_dimension_numbers<[1], [0], [0], [1], [0, 0, 1, 1], [], []>} : vector<8x16xf32>, vector<16x32xf32>, vector<8x32xf32> -> vector<8x32xf32>
    %495 = vector.broadcast %3 : vector<1x32xf32> to vector<8x32xf32>
    %496 = arith.addf %494, %495 : vector<8x32xf32>
    %cst_259 = arith.constant 0.000000e+00 : f32
    %497 = vector.broadcast %cst_259 : f32 to vector<8x32xf32>
    %498 = arith.maximumf %496, %497 : vector<8x32xf32>
    %cst_260 = arith.constant dense<0.000000e+00> : vector<8x16xf32>
    %499 = tpu.matmul %498, %4, %cst_260 {dimension_numbers = #tpu.dot_dimension_numbers<[1], [0], [0], [1], [0, 0, 1, 1], [], []>} : vector<8x32xf32>, vector<32x16xf32>, vector<8x16xf32> -> vector<8x16xf32>
    %500 = vector.broadcast %5 : vector<1x16xf32> to vector<8x16xf32>
    %501 = arith.addf %499, %500 : vector<8x16xf32>
    %502 = arith.subf %501, %1 : vector<8x16xf32>
    %503 = math.absf %502 : vector<8x16xf32>
    %cst_261 = arith.constant 1.000000e+00 : f32
    %504 = vector.broadcast %cst_261 : f32 to vector<8x16xf32>
    %505 = arith.cmpf olt, %503, %504 : vector<8x16xf32>
    %cst_262 = arith.constant 5.000000e-01 : f32
    %506 = vector.broadcast %cst_262 : f32 to vector<8x16xf32>
    %507 = arith.mulf %506, %502 : vector<8x16xf32>
    %508 = arith.mulf %507, %502 : vector<8x16xf32>
    %cst_263 = arith.constant 5.000000e-01 : f32
    %509 = vector.broadcast %cst_263 : f32 to vector<8x16xf32>
    %510 = arith.subf %503, %509 : vector<8x16xf32>
    %511 = arith.select %505, %508, %510 : vector<8x16xi1>, vector<8x16xf32>
    %cst_264 = arith.constant 7.812500e-03 : f32
    %512 = vector.broadcast %cst_264 : f32 to vector<8x16xf32>
    %513 = arith.mulf %511, %512 : vector<8x16xf32>
    %cst_265 = arith.constant dense<0.000000e+00> : vector<8xf32>
    %514 = vector.multi_reduction <add>, %513, %cst_265 [1] : vector<8x16xf32> to vector<8xf32>
    %515 = vector.shape_cast %514 : vector<8xf32> to vector<8x1xf32>
    %cst_266 = arith.constant dense<0.000000e+00> : vector<1xf32>
    %516 = vector.multi_reduction <add>, %515, %cst_266 [0] : vector<8x1xf32> to vector<1xf32>
    %517 = vector.shape_cast %516 : vector<1xf32> to vector<1x1xf32>
    %cst_267 = arith.constant 0.000000e+00 : f32
    %518 = vector.broadcast %cst_267 : f32 to vector<8x16xf32>
    %519 = arith.cmpf ogt, %502, %518 : vector<8x16xf32>
    %cst_268 = arith.constant 1.000000e+00 : f32
    %cst_269 = arith.constant -1.000000e+00 : f32
    %520 = vector.broadcast %cst_268 : f32 to vector<8x16xf32>
    %521 = vector.broadcast %cst_269 : f32 to vector<8x16xf32>
    %522 = arith.select %519, %520, %521 : vector<8x16xi1>, vector<8x16xf32>
    %523 = arith.select %505, %502, %522 : vector<8x16xi1>, vector<8x16xf32>
    %cst_270 = arith.constant 7.812500e-03 : f32
    %524 = vector.broadcast %cst_270 : f32 to vector<8x16xf32>
    %525 = arith.mulf %523, %524 : vector<8x16xf32>
    %cst_271 = arith.constant dense<0.000000e+00> : vector<8x32xf32>
    %526 = tpu.matmul %525, %7, %cst_271 {dimension_numbers = #tpu.dot_dimension_numbers<[1], [0], [0], [1], [0, 0, 1, 1], [], []>} : vector<8x16xf32>, vector<16x32xf32>, vector<8x32xf32> -> vector<8x32xf32>
    %cst_272 = arith.constant 0.000000e+00 : f32
    %527 = vector.broadcast %cst_272 : f32 to vector<8x32xf32>
    %528 = arith.cmpf ogt, %496, %527 : vector<8x32xf32>
    %cst_273 = arith.constant 0.000000e+00 : f32
    %529 = vector.broadcast %cst_273 : f32 to vector<8x32xf32>
    %530 = arith.select %528, %526, %529 : vector<8x32xi1>, vector<8x32xf32>
    %cst_274 = arith.constant dense<0.000000e+00> : vector<8x16xf32>
    %531 = tpu.matmul %530, %6, %cst_274 {dimension_numbers = #tpu.dot_dimension_numbers<[1], [0], [0], [1], [0, 0, 1, 1], [], []>} : vector<8x32xf32>, vector<32x16xf32>, vector<8x16xf32> -> vector<8x16xf32>
    %532 = arith.mulf %531, %531 : vector<8x16xf32>
    %cst_275 = arith.constant 8.000000e+00 : f32
    %533 = vector.broadcast %cst_275 : f32 to vector<8x16xf32>
    %534 = arith.mulf %532, %533 : vector<8x16xf32>
    %cst_276 = arith.constant dense<0.000000e+00> : vector<8xf32>
    %535 = vector.multi_reduction <add>, %534, %cst_276 [1] : vector<8x16xf32> to vector<8xf32>
    %536 = vector.shape_cast %535 : vector<8xf32> to vector<8x1xf32>
    %cst_277 = arith.constant dense<0.000000e+00> : vector<1xf32>
    %537 = vector.multi_reduction <add>, %536, %cst_277 [0] : vector<8x1xf32> to vector<1xf32>
    %538 = vector.shape_cast %537 : vector<1xf32> to vector<1x1xf32>
    %539 = math.sqrt %538 : vector<1x1xf32>
    %cst_278 = arith.constant 4.000000e+00 : f32
    %540 = vector.broadcast %cst_278 : f32 to vector<8x16xf32>
    %541 = arith.mulf %540, %531 : vector<8x16xf32>
    %542 = arith.subf %488, %541 : vector<8x16xf32>
    %c9 = arith.constant 9 : index
    %c0_279 = arith.constant 0 : index
    %c0_280 = arith.constant 0 : index
    %543 = vector.load %arg8[%c9, %c0_279, %c0_280] : memref<10x8x16xf32, #tpu.memory_space<vmem>>, vector<1x8x16xf32>
    %544 = vector.shape_cast %543 : vector<1x8x16xf32> to vector<8x16xf32>
    %545 = vector.shape_cast %542 : vector<8x16xf32> to vector<1x8x16xf32>
    tpu.vector_store %arg8[%c9, %c0_279, %c0_280], %545 {strides = array<i32>} : memref<10x8x16xf32, #tpu.memory_space<vmem>>, vector<1x8x16xf32>,
    %c9_281 = arith.constant 9 : index
    %c0_282 = arith.constant 0 : index
    %546 = vector.load %arg9[%c9_281, %c0_282] : memref<10x1xf32, #tpu.memory_space<vmem>>, vector<1x1xf32>
    tpu.vector_store %arg9[%c9_281, %c0_282], %517 {strides = array<i32>} : memref<10x1xf32, #tpu.memory_space<vmem>>, vector<1x1xf32>,
    %c9_283 = arith.constant 9 : index
    %c0_284 = arith.constant 0 : index
    %547 = vector.load %arg10[%c9_283, %c0_284] : memref<10x1xf32, #tpu.memory_space<vmem>>, vector<1x1xf32>
    tpu.vector_store %arg10[%c9_283, %c0_284], %539 {strides = array<i32>} : memref<10x1xf32, #tpu.memory_space<vmem>>, vector<1x1xf32>,
    return
  }
}

</mosaic_0001>

<bundles_post_ra>
// kernel: tpu_custom_call.1
= control target key start
LH: loop header
LB: loop body
LE: loop exit
PB: predicated region body
PF: predicated region fallthrough
CT: control target
= control target key end

     0   :  { %vm52_vm0 = vcmask 130048   ;;  %s2312_s0 = inlined_call_operand.vmem [shape: f32[8,16], index: 0, kind: input, shape index: {}]   ;;  %s2313_s1 = inlined_call_operand.vmem [shape: f32[8,16], index: 1, kind: input, shape index: {}]   ;;  %s2314_s2 = inlined_call_operand.vmem [shape: f32[16,32], index: 2, kind: input, shape index: {}]   ;;  %s2315_s3 = inlined_call_operand.vmem [shape: f32[1,32], index: 3, kind: input, shape index: {}]   ;;  %s2316_s4 = inlined_call_operand.vmem [shape: f32[32,16], index: 4, kind: input, shape index: {}]   ;;  %s2317_s5 = inlined_call_operand.vmem [shape: f32[1,16], index: 5, kind: input, shape index: {}]   ;;  %s2318_s6 = inlined_call_operand.vmem [shape: f32[32,16], index: 6, kind: input, shape index: {}]   ;;  %s2319_s7 = inlined_call_operand.vmem [shape: f32[16,32], index: 7, kind: input, shape index: {}]   ;;  %s2320_s8 = inlined_call_operand.hbm [shape: f32[10,8,16], index: 8, kind: output, shape index: {0}]   ;;  %s2321_s9 = inlined_call_operand.vmem [shape: f32[10,1], index: 9, kind: output, shape index: {1}]   ;;  %s2322_s10 = inlined_call_operand.vmem [shape: f32[10,1], index: 10, kind: output, shape index: {2}]  }
   0x1   :  { %v1700_v0 = vld [vmem:[%s2314_s2 + $0x8] sm:$0xff]  ;;  %v1705_v1 = vld [vmem:[%s2314_s2] sm:$0xff]  ;;  %v1716_v3 = vld [vmem:[%s2316_s4 + $0x18] sm:$0xff] }
   0x2   :  { %70 = vmatpush.msra.mxu0 %v1700_v0  ;;  %v1711_v2 = vld [vmem:[%s2312_s0] sm:$0xff]  ;;  %96 = vmatpush.msra.mxu1 %v1716_v3 }
   0x3   :  { %16 = vsyncpa [#allocation3], 0  ;;  %v1729_v4 = vld [vmem:[%s2316_s4 + $0x10] sm:$0xff]  ;;  %v1735_v5 = vld [vmem:[%s2316_s4 + $0x8] sm:$0xff]  ;;  %vm80_vm1 = vcmask 261120   ;;  %v1638_v20 = vmov -1.0  }
   0x4   :  { %71 = vmatpush.msra.mxu0 %v1705_v1  ;;  %97 = vmatpush.msra.mxu1 %v1729_v4  ;;  %v1741_v6 = vld [vmem:[%s2316_s4] sm:$0xff]  ;;  %v1757_v11 = vld [vmem:[%s2319_s7 + $0x8] sm:$0xff]  ;;  %v1796_v29 = vld [vmem:[%s2318_s6 + $0x18] sm:$0xff]  ;;  %vm199_vm4 = vcmask 0   ;;  %s1639_s28 = smov [#allocation2]   ;;  %s1513_s30 = sshll.u32 %s2320_s8, 4  ;;  %s1514_s30 = int_to_ptr.hbm [resolvable:$true] %s1513_s30 }
   0x5   :  { %1533 = vmatmul.msk.f32.vlgmr.msra.gmra.mxu0 %vm52_vm0, %v1711_v2  ;;  %v1747_v7 = vld [vmem:[%s2315_s3] ss:$0 sm:$0xff]  ;;  %142 = vmatpush.msra.mxu2 %v1757_v11  ;;  %v1802_v30 = vld [vmem:[%s2318_s6 + $0x10] sm:$0xff]  ;;  %v1808_v31 = vld [vmem:[%s2318_s6 + $0x8] sm:$0xff]  ;;  %s1511_s4 = sshll.u32 %s1639_s28, 4  ;;  %s1640_s11 = smov 128   ;;  %s1512_s4 = int_to_ptr.vmem [resolvable:$true] %s1511_s4 }
   0x6   :  { %219 = vmatpush.msrb.mxu0 %v1700_v0  ;;  %98 = vmatpush.msra.mxu1 %v1735_v5  ;;  %v1762_v12 = vld [vmem:[%s2319_s7] sm:$0xff]  ;;  %s1641_s12 = smov 8  }
   0x7   :  { %143 = vmatpush.msra.mxu2 %v1762_v12  ;;  %v1777_v13 = vld [vmem:[%s2317_s5] ss:$0 sm:$0xff]  ;;  %165 = vmatpush.msra.mxu3 %v1796_v29 }
   0x8   :  { %220 = vmatpush.msrb.mxu0 %v1705_v1  ;;  %99 = vmatpush.msra.mxu1 %v1741_v6  ;;  %v1782_v14 = vld [vmem:[%s2313_s1] sm:$0xff] }
   0x9   :  { %241 = vmatpush.msrb.mxu2 %v1716_v3  ;;  %166 = vmatpush.msra.mxu3 %v1802_v30  ;;  %v1814_v32 = vld [vmem:[%s2318_s6] sm:$0xff] }
   0xa   :  { %364 = vmatpush.msra.mxu0 %v1700_v0  ;;  %287 = vmatpush.msrb.mxu1 %v1757_v11 }
   0xb   :  { %242 = vmatpush.msrb.mxu2 %v1729_v4  ;;  %167 = vmatpush.msra.mxu3 %v1808_v31 }
   0xc   :  { %365 = vmatpush.msra.mxu0 %v1705_v1  ;;  %288 = vmatpush.msrb.mxu1 %v1762_v12 }
   0xd   :  { %243 = vmatpush.msrb.mxu2 %v1735_v5  ;;  %168 = vmatpush.msra.mxu3 %v1814_v32 }
   0xf   :  { %244 = vmatpush.msrb.mxu2 %v1741_v6  ;;  %310 = vmatpush.msrb.mxu3 %v1796_v29 }
  0x11   :  { %311 = vmatpush.msrb.mxu3 %v1802_v30 }
  0x13   :  { %312 = vmatpush.msrb.mxu3 %v1808_v31 }
  0x15   :  { %313 = vmatpush.msrb.mxu3 %v1814_v32 }
  0x82   :  { %v73_v8 = vpop.f32.mrf.mxu0 }
  0x83   :  { %v1750_v9 = vadd.f32 %v1747_v7, %v73_v8 }
  0x85   :  { %v76_v10 = vmax.f32 %v1750_v9, 0.0  ;;  %vm148_vm5 = vcmp.gt.f32.partialorder %v1750_v9, 0.0 }
  0x87   :  { %1534 = vmatmul.msk.f32.vlgmr.msra.gmra.mxu1 %vm80_vm1, %v76_v10 }
  0x88   :  { %432 = vmatpush.msra.mxu1 %v1757_v11 }
  0x8a   :  { %433 = vmatpush.msra.mxu1 %v1762_v12 }
 0x104   :  { %v101_v15 = vpop.f32.mrf.mxu1 }
 0x105   :  { %v102_v16 = vadd.f32 %v1777_v13, %v101_v15 }
 0x107   :  { %v104_v17 = vsub.f32 %v102_v16, %v1782_v14 }
 0x109   :  { %v105_v18 = vand.u32 2147483647, %v104_v17  ;;  %vm121_vm2 = vcmp.gt.f32.partialorder %v104_v17, 0.0  ;;  %v107_v19 = vmul.f32 0.5, %v104_v17 }
 0x10a   :  { %v122_v21 = vsel %vm121_vm2, 1.0, %v1638_v20 }
 0x10b   :  { %vm106_vm3 = vcmp.lt.f32.partialorder %v105_v18, 1.0  ;;  %v108_v22 = vmul.f32 %v107_v19, %v104_v17  ;;  %v1535_v23 = vadd.f32 -0.5, %v105_v18 }
 0x10c   :  { %v123_v24 = vsel %vm106_vm3, %v104_v17, %v122_v21 }
 0x10d   :  { %v124_v25 = vmul.f32 0.0078125, %v123_v24  ;;  %v110_v26 = vsel %vm106_vm3, %v108_v22, %v1535_v23 }
 0x10e   :  { %v111_v27 = vmul.f32 0.0078125, %v110_v26 }
 0x10f   :  { %1536 = vmatmul.msk.f32.vlgmr.msra.gmra.mxu2 %vm52_vm0, %v124_v25 }
 0x110   :  { %v112_v28 = vsel %vm52_vm0, %v111_v27, 0.0  ;;  %386 = vmatpush.msra.mxu2 %v1716_v3 }
 0x111   :  { %113 = vadd.xlane.f32.xlu1 %v112_v28 }
 0x112   :  { %387 = vmatpush.msra.mxu2 %v1729_v4 }
 0x114   :  { %388 = vmatpush.msra.mxu2 %v1735_v5 }
 0x116   :  { %389 = vmatpush.msra.mxu2 %v1741_v6 }
 0x184   :  { %v114_v33 = vpop.xlane.xlu1 %113 }
 0x185   :  { %v115_v34 = vrot.slane %v114_v33, 4 }
 0x187   :  { %v116_v35 = vadd.f32 %v115_v34, %v114_v33 }
 0x189   :  { %v117_v36 = vrot.slane %v116_v35, 2 }
 0x18b   :  { %v118_v37 = vadd.f32 %v117_v36, %v116_v35 }
 0x18d   :  { %v119_v38 = vrot.slane %v118_v37, 1 }
 0x18f   :  { %v120_v39 = vadd.f32 %v119_v38, %v118_v37 }
 0x191   :  { %200 = vst.msk [vmem:[%s2321_s9] sm:$0x1] %vm199_vm4, %v120_v39 }
 0x192   :  { %v145_v40 = vpop.f32.mrf.mxu2 }
 0x193   :  { %v149_v41 = vsel %vm148_vm5, %v145_v40, 0.0 }
 0x194   :  { %1537 = vmatmul.msk.f32.vlgmr.msra.gmra.mxu3 %vm80_vm1, %v149_v41 }
 0x195   :  { %455 = vmatpush.msra.mxu3 %v1796_v29 }
 0x197   :  { %456 = vmatpush.msra.mxu3 %v1802_v30 }
 0x199   :  { %457 = vmatpush.msra.mxu3 %v1808_v31 }
 0x19b   :  { %458 = vmatpush.msra.mxu3 %v1814_v32 }
 0x217   :  { %v170_v42 = vpop.f32.mrf.mxu3 }
 0x218   :  { %v173_v43 = vmul.f32 %v170_v42, %v170_v42  ;;  %v196_v44 = vmul.f32 4.0, %v170_v42 }
 0x21a   :  { %v1832_v45 = vsub.f32 %v1711_v2, %v196_v44  ;;  %v174_v46 = vmul.f32 8.0, %v173_v43 }
 0x21c   :  { %198 = vst.msk [vmem:[#allocation2] sm:$0xff] %vm52_vm0, %v1832_v45  ;;  %1538 = vmatmul.msk.f32.vlgmr.msrb.gmra.mxu0 %vm52_vm0, %v1832_v45  ;;  %v175_v47 = vsel %vm52_vm0, %v174_v46, 0.0 }
 0x21d   :  { %176 = vadd.xlane.f32.xlu0 %v175_v47  ;;  %509 = vmatpush.msrb.mxu0 %v1700_v0 }
 0x21f   :  { %510 = vmatpush.msrb.mxu0 %v1705_v1 }
 0x290   :  { %v177_v48 = vpop.xlane.xlu0 %176 }
 0x291   :  { %v178_v49 = vrot.slane %v177_v48, 4 }
 0x293   :  { %v179_v50 = vadd.f32 %v178_v49, %v177_v48 }
 0x295   :  { %v180_v51 = vrot.slane %v179_v50, 2 }
 0x297   :  { %v181_v52 = vadd.f32 %v180_v51, %v179_v50 }
 0x299   :  { %v182_v53 = vrot.slane %v181_v52, 1  ;;  %v222_v54 = vpop.f32.mrf.mxu0 }
 0x29a   :  { %v223_v55 = vadd.f32 %v1747_v7, %v222_v54 }
 0x29b   :  { %v183_v56 = vadd.f32 %v182_v53, %v181_v52 }
 0x29c   :  { %v225_v57 = vmax.f32 %v223_v55, 0.0  ;;  %vm293_vm10 = vcmp.gt.f32.partialorder %v223_v55, 0.0 }
 0x29d   :  { %1589 = vrsqrt.f32 %v183_v56  ;;  %vm191_vm6 = vcmp.eq.f32.partialorder %v183_v56, inf  ;;  %v194_v8 = vand.u32 2147483648, %v183_v56  ;;  %vm193_vm7 = vcmp.eq.f32.partialorder %v183_v56, 0.0 }
 0x29e   :  { %1539 = vmatmul.msk.f32.vlgmr.msrb.gmra.mxu2 %vm80_vm1, %v225_v57 }
 0x29f   :  { %531 = vmatpush.msrb.mxu2 %v1716_v3 }
 0x2a1   :  { %532 = vmatpush.msrb.mxu2 %v1729_v4 }
 0x2a3   :  { %v1590_v58 = vpop.eup %1589  ;;  %533 = vmatpush.msrb.mxu2 %v1735_v5 }
 0x2a4   :  { %v185_v59 = vmul.f32 %v1590_v58, %v183_v56 }
 0x2a5   :  { %534 = vmatpush.msrb.mxu2 %v1741_v6 }
 0x2a6   :  { %v186_v60 = vmul.f32 %v1590_v58, %v185_v59 }
 0x2a8   :  { %v187_v61 = vmul.f32 0.5, %v186_v60 }
 0x2aa   :  { %v188_v62 = vsub.f32 1.5, %v187_v61 }
 0x2ac   :  { %v189_v63 = vmul.f32 %v1590_v58, %v188_v62 }
 0x2ae   :  { %v190_v2 = vmul.f32 %v189_v63, %v183_v56 }
 0x2b0   :  { %v192_v9 = vsel %vm191_vm6, %v183_v56, %v190_v2 }
 0x2b1   :  { %v195_v10 = vsel %vm193_vm7, %v194_v8, %v192_v9 }
 0x2b2   :  { %201 = vst.msk [vmem:[%s2322_s10] sm:$0x1] %vm199_vm4, %v195_v10 }
 0x321   :  { %v246_v15 = vpop.f32.mrf.mxu2 }
 0x322   :  { %v247_v16 = vadd.f32 %v1777_v13, %v246_v15 }
 0x324   :  { %v249_v17 = vsub.f32 %v247_v16, %v1782_v14 }
 0x326   :  { %v250_v18 = vand.u32 2147483647, %v249_v17  ;;  %vm266_vm8 = vcmp.gt.f32.partialorder %v249_v17, 0.0  ;;  %v252_v19 = vmul.f32 0.5, %v249_v17 }
 0x327   :  { %v267_v21 = vsel %vm266_vm8, 1.0, %v1638_v20 }
 0x328   :  { %vm1854_vm9 = vcmp.lt.f32.partialorder %v250_v18, 1.0  ;;  %v1858_v23 = vmul.f32 %v252_v19, %v249_v17  ;;  %v1860_v24 = vadd.f32 -0.5, %v250_v18 }
 0x329   :  { %v268_v25 = vsel %vm1854_vm9, %v249_v17, %v267_v21 }
 0x32a   :  { %v269_v26 = vmul.f32 0.0078125, %v268_v25  ;;  %v255_v27 = vsel %vm1854_vm9, %v1858_v23, %v1860_v24 }
 0x32c   :  { %1541 = vmatmul.msk.f32.vlgmr.msrb.gmra.mxu1 %vm52_vm0, %v269_v26 }
 0x32d   :  { %577 = vmatpush.msrb.mxu1 %v1757_v11 }
 0x32f   :  { %578 = vmatpush.msrb.mxu1 %v1762_v12 }
 0x3a9   :  { %v290_v28 = vpop.f32.mrf.mxu1 }
 0x3aa   :  { %v294_v33 = vsel %vm293_vm10, %v290_v28, 0.0 }
 0x3ab   :  { %1542 = vmatmul.msk.f32.vlgmr.msrb.gmra.mxu3 %vm80_vm1, %v294_v33 }
 0x3ac   :  { %600 = vmatpush.msrb.mxu3 %v1796_v29 }
 0x3ae   :  { %601 = vmatpush.msrb.mxu3 %v1802_v30 }
 0x3b0   :  { %602 = vmatpush.msrb.mxu3 %v1808_v31 }
 0x3b2   :  { %603 = vmatpush.msrb.mxu3 %v1814_v32 }
 0x42e   :  { %v315_v34 = vpop.f32.mrf.mxu3 }
 0x42f   :  { %v318_v35 = vmul.f32 %v315_v34, %v315_v34  ;;  %v341_v36 = vmul.f32 4.0, %v315_v34 }
 0x431   :  { %v319_v37 = vmul.f32 8.0, %v318_v35  ;;  %v1877_v38 = vsub.f32 %v1832_v45, %v341_v36 }
 0x433   :  { %344 = vst.msk [vmem:[#allocation2 + $0x8] sm:$0xff] %vm52_vm0, %v1877_v38  ;;  %1543 = vmatmul.msk.f32.vlgmr.msra.gmra.mxu0 %vm52_vm0, %v1877_v38  ;;  %v320_v39 = vsel %vm52_vm0, %v319_v37, 0.0 }
 0x434   :  { %321 = vadd.xlane.f32.xlu0 %v320_v39  ;;  %654 = vmatpush.msra.mxu0 %v1700_v0 }
 0x436   :  { %655 = vmatpush.msra.mxu0 %v1705_v1 }
 0x4a7   :  { %v322_v40 = vpop.xlane.xlu0 %321 }
 0x4a8   :  { %v323_v41 = vrot.slane %v322_v40, 4 }
 0x4aa   :  { %v324_v42 = vadd.f32 %v323_v41, %v322_v40 }
 0x4ac   :  { %v325_v43 = vrot.slane %v324_v42, 2 }
 0x4ae   :  { %v326_v44 = vadd.f32 %v325_v43, %v324_v42 }
 0x4b0   :  { %v327_v45 = vrot.slane %v326_v44, 1  ;;  %v367_v46 = vpop.f32.mrf.mxu0 }
 0x4b1   :  { %v368_v47 = vadd.f32 %v1747_v7, %v367_v46 }
 0x4b2   :  { %v328_v48 = vadd.f32 %v327_v45, %v326_v44 }
 0x4b3   :  { %v370_v49 = vmax.f32 %v368_v47, 0.0  ;;  %vm438_vm15 = vcmp.gt.f32.partialorder %v368_v47, 0.0 }
 0x4b4   :  { %1591 = vrsqrt.f32 %v328_v48  ;;  %vm336_vm11 = vcmp.eq.f32.partialorder %v328_v48, inf  ;;  %v339_v57 = vand.u32 2147483648, %v328_v48  ;;  %vm338_vm12 = vcmp.eq.f32.partialorder %v328_v48, 0.0 }
 0x4b5   :  { %1544 = vmatmul.msk.f32.vlgmr.msra.gmra.mxu2 %vm80_vm1, %v370_v49 }
 0x4b6   :  { %676 = vmatpush.msra.mxu2 %v1716_v3 }
 0x4b8   :  { %677 = vmatpush.msra.mxu2 %v1729_v4 }
 0x4ba   :  { %v1592_v50 = vpop.eup %1591  ;;  %678 = vmatpush.msra.mxu2 %v1735_v5 }
 0x4bb   :  { %v330_v51 = vmul.f32 %v1592_v50, %v328_v48 }
 0x4bc   :  { %679 = vmatpush.msra.mxu2 %v1741_v6 }
 0x4bd   :  { %v331_v52 = vmul.f32 %v1592_v50, %v330_v51 }
 0x4bf   :  { %v332_v53 = vmul.f32 0.5, %v331_v52 }
 0x4c1   :  { %v333_v54 = vsub.f32 1.5, %v332_v53 }
 0x4c3   :  { %v334_v55 = vmul.f32 %v1592_v50, %v333_v54 }
 0x4c5   :  { %v335_v56 = vmul.f32 %v334_v55, %v328_v48 }
 0x4c7   :  { %v337_v58 = vsel %vm336_vm11, %v328_v48, %v335_v56 }
 0x4c8   :  { %v340_v59 = vsel %vm338_vm12, %v339_v57, %v337_v58 }
 0x4c9   :  { %346 = vst.msk [vmem:[%s2322_s10 + $0x1] sm:$0x1] %vm199_vm4, %v340_v59 }
 0x538   :  { %v391_v60 = vpop.f32.mrf.mxu2 }
 0x539   :  { %v392_v61 = vadd.f32 %v1777_v13, %v391_v60 }
 0x53b   :  { %v394_v62 = vsub.f32 %v392_v61, %v1782_v14 }
 0x53d   :  { %v395_v63 = vand.u32 2147483647, %v394_v62  ;;  %vm411_vm13 = vcmp.gt.f32.partialorder %v394_v62, 0.0  ;;  %v397_v2 = vmul.f32 0.5, %v394_v62 }
 0x53e   :  { %v412_v8 = vsel %vm411_vm13, 1.0, %v1638_v20 }
 0x53f   :  { %vm1899_vm14 = vcmp.lt.f32.partialorder %v395_v63, 1.0  ;;  %v1903_v10 = vmul.f32 %v397_v2, %v394_v62  ;;  %v1905_v15 = vadd.f32 -0.5, %v395_v63 }
 0x540   :  { %v413_v16 = vsel %vm1899_vm14, %v394_v62, %v412_v8 }
 0x541   :  { %v414_v17 = vmul.f32 0.0078125, %v413_v16  ;;  %v400_v18 = vsel %vm1899_vm14, %v1903_v10, %v1905_v15 }
 0x543   :  { %1546 = vmatmul.msk.f32.vlgmr.msra.gmra.mxu1 %vm52_vm0, %v414_v17 }
 0x544   :  { %722 = vmatpush.msra.mxu1 %v1757_v11 }
 0x546   :  { %723 = vmatpush.msra.mxu1 %v1762_v12 }
 0x5c0   :  { %v435_v19 = vpop.f32.mrf.mxu1 }
 0x5c1   :  { %v439_v21 = vsel %vm438_vm15, %v435_v19, 0.0 }
 0x5c2   :  { %1547 = vmatmul.msk.f32.vlgmr.msra.gmra.mxu3 %vm80_vm1, %v439_v21 }
 0x5c3   :  { %745 = vmatpush.msra.mxu3 %v1796_v29 }
 0x5c5   :  { %746 = vmatpush.msra.mxu3 %v1802_v30 }
 0x5c7   :  { %747 = vmatpush.msra.mxu3 %v1808_v31 }
 0x5c9   :  { %748 = vmatpush.msra.mxu3 %v1814_v32 }
 0x645   :  { %v460_v25 = vpop.f32.mrf.mxu3 }
 0x646   :  { %v463_v26 = vmul.f32 %v460_v25, %v460_v25  ;;  %v486_v28 = vmul.f32 4.0, %v460_v25 }
 0x648   :  { %v464_v33 = vmul.f32 8.0, %v463_v26  ;;  %v1922_v34 = vsub.f32 %v1877_v38, %v486_v28 }
 0x64a   :  { %489 = vst.msk [vmem:[#allocation2 + $0x10] sm:$0xff] %vm52_vm0, %v1922_v34  ;;  %1548 = vmatmul.msk.f32.vlgmr.msrb.gmra.mxu0 %vm52_vm0, %v1922_v34  ;;  %v465_v35 = vsel %vm52_vm0, %v464_v33, 0.0 }
 0x64b   :  { %466 = vadd.xlane.f32.xlu1 %v465_v35  ;;  %799 = vmatpush.msrb.mxu0 %v1700_v0 }
 0x64d   :  { %800 = vmatpush.msrb.mxu0 %v1705_v1 }
 0x6be   :  { %v467_v36 = vpop.xlane.xlu1 %466 }
 0x6bf   :  { %v468_v37 = vrot.slane %v467_v36, 4 }
 0x6c1   :  { %v469_v39 = vadd.f32 %v468_v37, %v467_v36 }
 0x6c3   :  { %v470_v40 = vrot.slane %v469_v39, 2 }
 0x6c5   :  { %v471_v41 = vadd.f32 %v470_v40, %v469_v39 }
 0x6c7   :  { %v472_v38 = vrot.slane %v471_v41, 1  ;;  %v512_v42 = vpop.f32.mrf.mxu0 }
 0x6c8   :  { %v513_v43 = vadd.f32 %v1747_v7, %v512_v42 }
 0x6c9   :  { %v473_v44 = vadd.f32 %v472_v38, %v471_v41 }
 0x6ca   :  { %v515_v45 = vmax.f32 %v513_v43, 0.0  ;;  %vm583_vm7 = vcmp.gt.f32.partialorder %v513_v43, 0.0 }
 0x6cb   :  { %1593 = vrsqrt.f32 %v473_v44  ;;  %vm481_vm2 = vcmp.eq.f32.partialorder %v473_v44, inf  ;;  %v484_v53 = vand.u32 2147483648, %v473_v44  ;;  %vm483_vm3 = vcmp.eq.f32.partialorder %v473_v44, 0.0 }
 0x6cc   :  { %1549 = vmatmul.msk.f32.vlgmr.msrb.gmra.mxu2 %vm80_vm1, %v515_v45 }
 0x6cd   :  { %821 = vmatpush.msrb.mxu2 %v1716_v3 }
 0x6cf   :  { %822 = vmatpush.msrb.mxu2 %v1729_v4 }
 0x6d1   :  { %v1594_v46 = vpop.eup %1593  ;;  %823 = vmatpush.msrb.mxu2 %v1735_v5 }
 0x6d2   :  { %v475_v47 = vmul.f32 %v1594_v46, %v473_v44 }
 0x6d3   :  { %824 = vmatpush.msrb.mxu2 %v1741_v6 }
 0x6d4   :  { %v476_v48 = vmul.f32 %v1594_v46, %v475_v47 }
 0x6d6   :  { %v477_v49 = vmul.f32 0.5, %v476_v48 }
 0x6d8   :  { %v478_v50 = vsub.f32 1.5, %v477_v49 }
 0x6da   :  { %v479_v51 = vmul.f32 %v1594_v46, %v478_v50 }
 0x6dc   :  { %v480_v52 = vmul.f32 %v479_v51, %v473_v44 }
 0x6de   :  { %v482_v54 = vsel %vm481_vm2, %v473_v44, %v480_v52 }
 0x6df   :  { %v485_v55 = vsel %vm483_vm3, %v484_v53, %v482_v54 }
 0x6e0   :  { %491 = vst.msk [vmem:[%s2322_s10 + $0x2] sm:$0x1] %vm199_vm4, %v485_v55 }
 0x74f   :  { %v536_v56 = vpop.f32.mrf.mxu2 }
 0x750   :  { %v537_v57 = vadd.f32 %v1777_v13, %v536_v56 }
 0x752   :  { %v539_v58 = vsub.f32 %v537_v57, %v1782_v14 }
 0x754   :  { %v540_v59 = vand.u32 2147483647, %v539_v58  ;;  %vm556_vm5 = vcmp.gt.f32.partialorder %v539_v58, 0.0  ;;  %v542_v60 = vmul.f32 0.5, %v539_v58 }
 0x755   :  { %v557_v61 = vsel %vm556_vm5, 1.0, %v1638_v20 }
 0x756   :  { %vm1944_vm6 = vcmp.lt.f32.partialorder %v540_v59, 1.0  ;;  %v1948_v63 = vmul.f32 %v542_v60, %v539_v58  ;;  %v1950_v2 = vadd.f32 -0.5, %v540_v59 }
 0x757   :  { %v558_v8 = vsel %vm1944_vm6, %v539_v58, %v557_v61 }
 0x758   :  { %v559_v16 = vmul.f32 0.0078125, %v558_v8  ;;  %v545_v17 = vsel %vm1944_vm6, %v1948_v63, %v1950_v2 }
 0x75a   :  { %1551 = vmatmul.msk.f32.vlgmr.msrb.gmra.mxu1 %vm52_vm0, %v559_v16 }
 0x75b   :  { %867 = vmatpush.msrb.mxu1 %v1757_v11 }
 0x75d   :  { %868 = vmatpush.msrb.mxu1 %v1762_v12 }
 0x7d7   :  { %v580_v19 = vpop.f32.mrf.mxu1 }
 0x7d8   :  { %v584_v21 = vsel %vm583_vm7, %v580_v19, 0.0 }
 0x7d9   :  { %1552 = vmatmul.msk.f32.vlgmr.msrb.gmra.mxu3 %vm80_vm1, %v584_v21 }
 0x7da   :  { %890 = vmatpush.msrb.mxu3 %v1796_v29 }
 0x7dc   :  { %891 = vmatpush.msrb.mxu3 %v1802_v30 }
 0x7de   :  { %892 = vmatpush.msrb.mxu3 %v1808_v31 }
 0x7e0   :  { %893 = vmatpush.msrb.mxu3 %v1814_v32 }
 0x85c   :  { %v605_v25 = vpop.f32.mrf.mxu3 }
 0x85d   :  { %v608_v26 = vmul.f32 %v605_v25, %v605_v25  ;;  %v631_v28 = vmul.f32 4.0, %v605_v25 }
 0x85f   :  { %v609_v33 = vmul.f32 8.0, %v608_v26  ;;  %v1967_v35 = vsub.f32 %v1922_v34, %v631_v28 }
 0x861   :  { %634 = vst.msk [vmem:[#allocation2 + $0x18] sm:$0xff] %vm52_vm0, %v1967_v35  ;;  %1553 = vmatmul.msk.f32.vlgmr.msra.gmra.mxu0 %vm52_vm0, %v1967_v35  ;;  %v610_v36 = vsel %vm52_vm0, %v609_v33, 0.0 }
 0x862   :  { %611 = vadd.xlane.f32.xlu1 %v610_v36  ;;  %944 = vmatpush.msra.mxu0 %v1700_v0 }
 0x864   :  { %945 = vmatpush.msra.mxu0 %v1705_v1 }
 0x8d5   :  { %v612_v37 = vpop.xlane.xlu1 %611 }
 0x8d6   :  { %v613_v39 = vrot.slane %v612_v37, 4 }
 0x8d8   :  { %v614_v40 = vadd.f32 %v613_v39, %v612_v37 }
 0x8da   :  { %v615_v41 = vrot.slane %v614_v40, 2 }
 0x8dc   :  { %v616_v38 = vadd.f32 %v615_v41, %v614_v40 }
 0x8de   :  { %v617_v34 = vrot.slane %v616_v38, 1  ;;  %v657_v42 = vpop.f32.mrf.mxu0 }
 0x8df   :  { %v658_v43 = vadd.f32 %v1747_v7, %v657_v42 }
 0x8e0   :  { %v618_v44 = vadd.f32 %v617_v34, %v616_v38 }
 0x8e1   :  { %v660_v45 = vmax.f32 %v658_v43, 0.0  ;;  %vm728_vm13 = vcmp.gt.f32.partialorder %v658_v43, 0.0 }
 0x8e2   :  { %1595 = vrsqrt.f32 %v618_v44  ;;  %vm626_vm8 = vcmp.eq.f32.partialorder %v618_v44, inf  ;;  %v629_v53 = vand.u32 2147483648, %v618_v44  ;;  %vm628_vm10 = vcmp.eq.f32.partialorder %v618_v44, 0.0 }
 0x8e3   :  { %1554 = vmatmul.msk.f32.vlgmr.msra.gmra.mxu2 %vm80_vm1, %v660_v45 }
 0x8e4   :  { %966 = vmatpush.msra.mxu2 %v1716_v3 }
 0x8e6   :  { %967 = vmatpush.msra.mxu2 %v1729_v4 }
 0x8e8   :  { %v1596_v46 = vpop.eup %1595  ;;  %968 = vmatpush.msra.mxu2 %v1735_v5 }
 0x8e9   :  { %v620_v47 = vmul.f32 %v1596_v46, %v618_v44 }
 0x8ea   :  { %969 = vmatpush.msra.mxu2 %v1741_v6 }
 0x8eb   :  { %v621_v48 = vmul.f32 %v1596_v46, %v620_v47 }
 0x8ed   :  { %v622_v49 = vmul.f32 0.5, %v621_v48 }
 0x8ef   :  { %v623_v50 = vsub.f32 1.5, %v622_v49 }
 0x8f1   :  { %v624_v51 = vmul.f32 %v1596_v46, %v623_v50 }
 0x8f3   :  { %v625_v52 = vmul.f32 %v624_v51, %v618_v44 }
 0x8f5   :  { %v627_v54 = vsel %vm626_vm8, %v618_v44, %v625_v52 }
 0x8f6   :  { %v630_v55 = vsel %vm628_vm10, %v629_v53, %v627_v54 }
 0x8f7   :  { %636 = vst.msk [vmem:[%s2322_s10 + $0x3] sm:$0x1] %vm199_vm4, %v630_v55 }
 0x966   :  { %v681_v56 = vpop.f32.mrf.mxu2 }
 0x967   :  { %v682_v57 = vadd.f32 %v1777_v13, %v681_v56 }
 0x969   :  { %v684_v58 = vsub.f32 %v682_v57, %v1782_v14 }
 0x96b   :  { %v685_v59 = vand.u32 2147483647, %v684_v58  ;;  %vm701_vm11 = vcmp.gt.f32.partialorder %v684_v58, 0.0  ;;  %v687_v60 = vmul.f32 0.5, %v684_v58 }
 0x96c   :  { %v702_v61 = vsel %vm701_vm11, 1.0, %v1638_v20 }
 0x96d   :  { %vm1989_vm12 = vcmp.lt.f32.partialorder %v685_v59, 1.0  ;;  %v1993_v16 = vmul.f32 %v687_v60, %v684_v58  ;;  %v1995_v19 = vadd.f32 -0.5, %v685_v59 }
 0x96e   :  { %v703_v21 = vsel %vm1989_vm12, %v684_v58, %v702_v61 }
 0x96f   :  { %v704_v25 = vmul.f32 0.0078125, %v703_v21  ;;  %v690_v26 = vsel %vm1989_vm12, %v1993_v16, %v1995_v19 }
 0x971   :  { %1556 = vmatmul.msk.f32.vlgmr.msra.gmra.mxu1 %vm52_vm0, %v704_v25 }
 0x972   :  { %1012 = vmatpush.msra.mxu1 %v1757_v11 }
 0x974   :  { %1013 = vmatpush.msra.mxu1 %v1762_v12 }
 0x9ee   :  { %v725_v28 = vpop.f32.mrf.mxu1 }
 0x9ef   :  { %v729_v33 = vsel %vm728_vm13, %v725_v28, 0.0 }
 0x9f0   :  { %1557 = vmatmul.msk.f32.vlgmr.msra.gmra.mxu3 %vm80_vm1, %v729_v33 }
 0x9f1   :  { %1035 = vmatpush.msra.mxu3 %v1796_v29 }
 0x9f3   :  { %1036 = vmatpush.msra.mxu3 %v1802_v30 }
 0x9f5   :  { %1037 = vmatpush.msra.mxu3 %v1808_v31 }
 0x9f7   :  { %1038 = vmatpush.msra.mxu3 %v1814_v32 }
 0xa73   :  { %v750_v36 = vpop.f32.mrf.mxu3 }
 0xa74   :  { %v753_v37 = vmul.f32 %v750_v36, %v750_v36  ;;  %v776_v39 = vmul.f32 4.0, %v750_v36 }
 0xa76   :  { %v2012_v40 = vsub.f32 %v1967_v35, %v776_v39  ;;  %v754_v41 = vmul.f32 8.0, %v753_v37 }
 0xa78   :  { %779 = vst.msk [vmem:[#allocation2 + $0x20] sm:$0xff] %vm52_vm0, %v2012_v40  ;;  %1558 = vmatmul.msk.f32.vlgmr.msrb.gmra.mxu0 %vm52_vm0, %v2012_v40  ;;  %v755_v38 = vsel %vm52_vm0, %v754_v41, 0.0 }
 0xa79   :  { %756 = vadd.xlane.f32.xlu2 %v755_v38  ;;  %1089 = vmatpush.msrb.mxu0 %v1700_v0 }
 0xa7b   :  { %1090 = vmatpush.msrb.mxu0 %v1705_v1 }
 0xaec   :  { %v757_v34 = vpop.xlane.xlu2 %756 }
 0xaed   :  { %v758_v42 = vrot.slane %v757_v34, 4 }
 0xaef   :  { %v759_v43 = vadd.f32 %v758_v42, %v757_v34 }
 0xaf1   :  { %v760_v44 = vrot.slane %v759_v43, 2 }
 0xaf3   :  { %v761_v35 = vadd.f32 %v760_v44, %v759_v43 }
 0xaf5   :  { %v762_v45 = vrot.slane %v761_v35, 1  ;;  %v802_v46 = vpop.f32.mrf.mxu0 }
 0xaf6   :  { %v803_v47 = vadd.f32 %v1747_v7, %v802_v46 }
 0xaf7   :  { %v763_v48 = vadd.f32 %v762_v45, %v761_v35 }
 0xaf8   :  { %v805_v49 = vmax.f32 %v803_v47, 0.0  ;;  %vm873_vm7 = vcmp.gt.f32.partialorder %v803_v47, 0.0 }
 0xaf9   :  { %1597 = vrsqrt.f32 %v763_v48  ;;  %vm771_vm15 = vcmp.eq.f32.partialorder %v763_v48, inf  ;;  %v774_v57 = vand.u32 2147483648, %v763_v48  ;;  %vm773_vm2 = vcmp.eq.f32.partialorder %v763_v48, 0.0 }
 0xafa   :  { %1559 = vmatmul.msk.f32.vlgmr.msrb.gmra.mxu2 %vm80_vm1, %v805_v49 }
 0xafb   :  { %1111 = vmatpush.msrb.mxu2 %v1716_v3 }
 0xafd   :  { %1112 = vmatpush.msrb.mxu2 %v1729_v4 }
 0xaff   :  { %v1598_v50 = vpop.eup %1597  ;;  %1113 = vmatpush.msrb.mxu2 %v1735_v5 }
 0xb00   :  { %v765_v51 = vmul.f32 %v1598_v50, %v763_v48 }
 0xb01   :  { %1114 = vmatpush.msrb.mxu2 %v1741_v6 }
 0xb02   :  { %v766_v52 = vmul.f32 %v1598_v50, %v765_v51 }
 0xb04   :  { %v767_v53 = vmul.f32 0.5, %v766_v52 }
 0xb06   :  { %v768_v54 = vsub.f32 1.5, %v767_v53 }
 0xb08   :  { %v769_v55 = vmul.f32 %v1598_v50, %v768_v54 }
 0xb0a   :  { %v770_v56 = vmul.f32 %v769_v55, %v763_v48 }
 0xb0c   :  { %v772_v58 = vsel %vm771_vm15, %v763_v48, %v770_v56 }
 0xb0d   :  { %v775_v59 = vsel %vm773_vm2, %v774_v57, %v772_v58 }
 0xb0e   :  { %781 = vst.msk [vmem:[%s2322_s10 + $0x4] sm:$0x1] %vm199_vm4, %v775_v59 }
 0xb7d   :  { %v826_v60 = vpop.f32.mrf.mxu2 }
 0xb7e   :  { %v827_v61 = vadd.f32 %v1777_v13, %v826_v60 }
 0xb80   :  { %v829_v21 = vsub.f32 %v827_v61, %v1782_v14 }
 0xb82   :  { %v830_v25 = vand.u32 2147483647, %v829_v21  ;;  %vm846_vm3 = vcmp.gt.f32.partialorder %v829_v21, 0.0  ;;  %v832_v28 = vmul.f32 0.5, %v829_v21 }
 0xb83   :  { %v847_v33 = vsel %vm846_vm3, 1.0, %v1638_v20 }
 0xb84   :  { %vm2034_vm5 = vcmp.lt.f32.partialorder %v830_v25, 1.0  ;;  %v2038_v37 = vmul.f32 %v832_v28, %v829_v21  ;;  %v2040_v39 = vadd.f32 -0.5, %v830_v25 }
 0xb85   :  { %v848_v41 = vsel %vm2034_vm5, %v829_v21, %v847_v33 }
 0xb86   :  { %v849_v38 = vmul.f32 0.0078125, %v848_v41  ;;  %v835_v34 = vsel %vm2034_vm5, %v2038_v37, %v2040_v39 }
 0xb88   :  { %1561 = vmatmul.msk.f32.vlgmr.msrb.gmra.mxu1 %vm52_vm0, %v849_v38 }
 0xb89   :  { %1157 = vmatpush.msrb.mxu1 %v1757_v11 }
 0xb8b   :  { %1158 = vmatpush.msrb.mxu1 %v1762_v12 }
 0xc05   :  { %v870_v42 = vpop.f32.mrf.mxu1 }
 0xc06   :  { %v874_v43 = vsel %vm873_vm7, %v870_v42, 0.0 }
 0xc07   :  { %1562 = vmatmul.msk.f32.vlgmr.msrb.gmra.mxu3 %vm80_vm1, %v874_v43 }
 0xc08   :  { %1180 = vmatpush.msrb.mxu3 %v1796_v29 }
 0xc0a   :  { %1181 = vmatpush.msrb.mxu3 %v1802_v30 }
 0xc0c   :  { %1182 = vmatpush.msrb.mxu3 %v1808_v31 }
 0xc0e   :  { %1183 = vmatpush.msrb.mxu3 %v1814_v32 }
 0xc8a   :  { %v895_v44 = vpop.f32.mrf.mxu3 }
 0xc8b   :  { %v898_v35 = vmul.f32 %v895_v44, %v895_v44  ;;  %v921_v45 = vmul.f32 4.0, %v895_v44 }
 0xc8d   :  { %v899_v46 = vmul.f32 8.0, %v898_v35  ;;  %v2057_v48 = vsub.f32 %v2012_v40, %v921_v45 }
 0xc8f   :  { %924 = vst.msk [vmem:[#allocation2 + $0x28] sm:$0xff] %vm52_vm0, %v2057_v48  ;;  %1563 = vmatmul.msk.f32.vlgmr.msra.gmra.mxu0 %vm52_vm0, %v2057_v48  ;;  %v900_v47 = vsel %vm52_vm0, %v899_v46, 0.0 }
 0xc90   :  { %901 = vadd.xlane.f32.xlu2 %v900_v47  ;;  %1234 = vmatpush.msra.mxu0 %v1700_v0  ;;  %v2169_v47 = vld [vmem:[%s2315_s3] ss:$0 sm:$0xff] }
 0xc92   :  { %1235 = vmatpush.msra.mxu0 %v1705_v1 }
 0xd03   :  { %v902_v49 = vpop.xlane.xlu2 %901 }
 0xd04   :  { %v903_v50 = vrot.slane %v902_v49, 4 }
 0xd06   :  { %v904_v51 = vadd.f32 %v903_v50, %v902_v49 }
 0xd08   :  { %v905_v52 = vrot.slane %v904_v51, 2 }
 0xd0a   :  { %v906_v53 = vadd.f32 %v905_v52, %v904_v51 }
 0xd0c   :  { %v907_v40 = vrot.slane %v906_v53, 1  ;;  %v947_v54 = vpop.f32.mrf.mxu0 }
 0xd0d   :  { %v948_v55 = vadd.f32 %v1747_v7, %v947_v54 }
 0xd0e   :  { %v908_v56 = vadd.f32 %v907_v40, %v906_v53 }
 0xd0f   :  { %v950_v57 = vmax.f32 %v948_v55, 0.0  ;;  %vm1018_vm15 = vcmp.gt.f32.partialorder %v948_v55, 0.0 }
 0xd10   :  { %1599 = vrsqrt.f32 %v908_v56  ;;  %vm916_vm8 = vcmp.eq.f32.partialorder %v908_v56, inf  ;;  %v919_v33 = vand.u32 2147483648, %v908_v56  ;;  %vm918_vm10 = vcmp.eq.f32.partialorder %v908_v56, 0.0 }
 0xd11   :  { %1564 = vmatmul.msk.f32.vlgmr.msra.gmra.mxu2 %vm80_vm1, %v950_v57 }
 0xd12   :  { %1256 = vmatpush.msra.mxu2 %v1716_v3 }
 0xd14   :  { %1257 = vmatpush.msra.mxu2 %v1729_v4 }
 0xd16   :  { %v1600_v58 = vpop.eup %1599  ;;  %1258 = vmatpush.msra.mxu2 %v1735_v5 }
 0xd17   :  { %v910_v59 = vmul.f32 %v1600_v58, %v908_v56 }
 0xd18   :  { %1259 = vmatpush.msra.mxu2 %v1741_v6 }
 0xd19   :  { %v911_v60 = vmul.f32 %v1600_v58, %v910_v59 }
 0xd1b   :  { %v912_v61 = vmul.f32 0.5, %v911_v60 }
 0xd1d   :  { %v913_v21 = vsub.f32 1.5, %v912_v61 }
 0xd1f   :  { %v914_v25 = vmul.f32 %v1600_v58, %v913_v21 }
 0xd21   :  { %v915_v28 = vmul.f32 %v914_v25, %v908_v56 }
 0xd23   :  { %v917_v41 = vsel %vm916_vm8, %v908_v56, %v915_v28 }
 0xd24   :  { %v920_v38 = vsel %vm918_vm10, %v919_v33, %v917_v41 }
 0xd25   :  { %926 = vst.msk [vmem:[%s2322_s10 + $0x5] sm:$0x1] %vm199_vm4, %v920_v38 }
 0xd94   :  { %v971_v42 = vpop.f32.mrf.mxu2 }
 0xd95   :  { %v972_v43 = vadd.f32 %v1777_v13, %v971_v42 }
 0xd97   :  { %v974_v44 = vsub.f32 %v972_v43, %v1782_v14 }
 0xd99   :  { %v975_v35 = vand.u32 2147483647, %v974_v44  ;;  %vm991_vm11 = vcmp.gt.f32.partialorder %v974_v44, 0.0  ;;  %v977_v45 = vmul.f32 0.5, %v974_v44 }
 0xd9a   :  { %v992_v46 = vsel %vm991_vm11, 1.0, %v1638_v20 }
 0xd9b   :  { %vm2079_vm13 = vcmp.lt.f32.partialorder %v975_v35, 1.0  ;;  %v2083_v49 = vmul.f32 %v977_v45, %v974_v44  ;;  %v2085_v50 = vadd.f32 -0.5, %v975_v35 }
 0xd9c   :  { %v993_v51 = vsel %vm2079_vm13, %v974_v44, %v992_v46 }
 0xd9d   :  { %v994_v52 = vmul.f32 0.0078125, %v993_v51  ;;  %v980_v53 = vsel %vm2079_vm13, %v2083_v49, %v2085_v50 }
 0xd9f   :  { %1566 = vmatmul.msk.f32.vlgmr.msra.gmra.mxu1 %vm52_vm0, %v994_v52 }
 0xda0   :  { %1302 = vmatpush.msra.mxu1 %v1757_v11 }
 0xda2   :  { %1303 = vmatpush.msra.mxu1 %v1762_v12 }
 0xe1c   :  { %v1015_v40 = vpop.f32.mrf.mxu1 }
 0xe1d   :  { %v1019_v54 = vsel %vm1018_vm15, %v1015_v40, 0.0 }
 0xe1e   :  { %1567 = vmatmul.msk.f32.vlgmr.msra.gmra.mxu3 %vm80_vm1, %v1019_v54 }
 0xe1f   :  { %1325 = vmatpush.msra.mxu3 %v1796_v29 }
 0xe21   :  { %1326 = vmatpush.msra.mxu3 %v1802_v30 }
 0xe23   :  { %1327 = vmatpush.msra.mxu3 %v1808_v31 }
 0xe25   :  { %1328 = vmatpush.msra.mxu3 %v1814_v32 }
 0xea1   :  { %v1040_v56 = vpop.f32.mrf.mxu3 }
 0xea2   :  { %v1043_v57 = vmul.f32 %v1040_v56, %v1040_v56  ;;  %v1066_v58 = vmul.f32 4.0, %v1040_v56 }
 0xea4   :  { %v1044_v59 = vmul.f32 8.0, %v1043_v57  ;;  %v2102_v60 = vsub.f32 %v2057_v48, %v1066_v58 }
 0xea6   :  { %1069 = vst.msk [vmem:[#allocation2 + $0x30] sm:$0xff] %vm52_vm0, %v2102_v60  ;;  %1568 = vmatmul.msk.f32.vlgmr.msrb.gmra.mxu0 %vm52_vm0, %v2102_v60  ;;  %v1045_v55 = vsel %vm52_vm0, %v1044_v59, 0.0 }
 0xea7   :  { %1046 = vadd.xlane.f32.xlu0 %v1045_v55  ;;  %1379 = vmatpush.msrb.mxu0 %v1700_v0 }
 0xea9   :  { %1380 = vmatpush.msrb.mxu0 %v1705_v1 }
 0xf1a   :  { %v1047_v61 = vpop.xlane.xlu0 %1046 }
 0xf1b   :  { %v1048_v21 = vrot.slane %v1047_v61, 4 }
 0xf1d   :  { %v1049_v25 = vadd.f32 %v1048_v21, %v1047_v61 }
 0xf1f   :  { %v1050_v28 = vrot.slane %v1049_v25, 2 }
 0xf21   :  { %v1051_v33 = vadd.f32 %v1050_v28, %v1049_v25 }
 0xf23   :  { %v1052_v48 = vrot.slane %v1051_v33, 1  ;;  %v1092_v41 = vpop.f32.mrf.mxu0 }
 0xf24   :  { %v1093_v38 = vadd.f32 %v1747_v7, %v1092_v41 }
 0xf25   :  { %v1053_v42 = vadd.f32 %v1052_v48, %v1051_v33 }
 0xf26   :  { %v1095_v43 = vmax.f32 %v1093_v38, 0.0  ;;  %vm1163_vm10 = vcmp.gt.f32.partialorder %v1093_v38, 0.0 }
 0xf27   :  { %1601 = vrsqrt.f32 %v1053_v42  ;;  %vm1061_vm2 = vcmp.eq.f32.partialorder %v1053_v42, inf  ;;  %v1064_v51 = vand.u32 2147483648, %v1053_v42  ;;  %vm1063_vm3 = vcmp.eq.f32.partialorder %v1053_v42, 0.0 }
 0xf28   :  { %1569 = vmatmul.msk.f32.vlgmr.msrb.gmra.mxu2 %vm80_vm1, %v1095_v43 }
 0xf29   :  { %1401 = vmatpush.msrb.mxu2 %v1716_v3 }
 0xf2b   :  { %1402 = vmatpush.msrb.mxu2 %v1729_v4 }
 0xf2d   :  { %v1602_v0 = vpop.eup %1601  ;;  %1403 = vmatpush.msrb.mxu2 %v1735_v5 }
 0xf2e   :  { %v1055_v1 = vmul.f32 %v1602_v0, %v1053_v42 }
 0xf2f   :  { %1404 = vmatpush.msrb.mxu2 %v1741_v6 }
 0xf30   :  { %v1056_v44 = vmul.f32 %v1602_v0, %v1055_v1 }
 0xf32   :  { %v1057_v35 = vmul.f32 0.5, %v1056_v44 }
 0xf34   :  { %v1058_v45 = vsub.f32 1.5, %v1057_v35 }
 0xf36   :  { %v1059_v46 = vmul.f32 %v1602_v0, %v1058_v45 }
 0xf38   :  { %v1060_v7 = vmul.f32 %v1059_v46, %v1053_v42 }
 0xf3a   :  { %v1062_v52 = vsel %vm1061_vm2, %v1053_v42, %v1060_v7 }
 0xf3b   :  { %v1065_v40 = vsel %vm1063_vm3, %v1064_v51, %v1062_v52 }
 0xf3c   :  { %1071 = vst.msk [vmem:[%s2322_s10 + $0x6] sm:$0x1] %vm199_vm4, %v1065_v40 }
 0xfab   :  { %v1116_v3 = vpop.f32.mrf.mxu2 }
 0xfac   :  { %v1117_v4 = vadd.f32 %v1777_v13, %v1116_v3 }
 0xfae   :  { %v1119_v5 = vsub.f32 %v1117_v4, %v1782_v14 }
 0xfb0   :  { %v1120_v6 = vand.u32 2147483647, %v1119_v5  ;;  %vm1136_vm7 = vcmp.gt.f32.partialorder %v1119_v5, 0.0  ;;  %v1122_v54 = vmul.f32 0.5, %v1119_v5 }
 0xfb1   :  { %v1137_v56 = vsel %vm1136_vm7, 1.0, %v1638_v20 }
 0xfb2   :  { %vm2124_vm8 = vcmp.lt.f32.partialorder %v1120_v6, 1.0  ;;  %v2128_v58 = vmul.f32 %v1122_v54, %v1119_v5  ;;  %v2130_v59 = vadd.f32 -0.5, %v1120_v6 }
 0xfb3   :  { %v1138_v55 = vsel %vm2124_vm8, %v1119_v5, %v1137_v56 }
 0xfb4   :  { %v1139_v61 = vmul.f32 0.0078125, %v1138_v55  ;;  %v1125_v13 = vsel %vm2124_vm8, %v2128_v58, %v2130_v59 }
 0xfb5   :  { %v1126_v22 = vmul.f32 0.0078125, %v1125_v13 }
 0xfb6   :  { %1571 = vmatmul.msk.f32.vlgmr.msrb.gmra.mxu1 %vm52_vm0, %v1139_v61 }
 0xfb7   :  { %1447 = vmatpush.msrb.mxu1 %v1757_v11  ;;  %v1127_v23 = vsel %vm52_vm0, %v1126_v22, 0.0 }
 0xfb9   :  { %1448 = vmatpush.msrb.mxu1 %v1762_v12 }
0x1033   :  { %v1160_v14 = vpop.f32.mrf.mxu1 }
0x1034   :  { %v1164_v21 = vsel %vm1163_vm10, %v1160_v14, 0.0 }
0x1035   :  { %1572 = vmatmul.msk.f32.vlgmr.msrb.gmra.mxu3 %vm80_vm1, %v1164_v21 }
0x1036   :  { %1470 = vmatpush.msrb.mxu3 %v1796_v29  ;;  %v546_v29 = vmul.f32 0.0078125, %v545_v17 }
0x1038   :  { %1471 = vmatpush.msrb.mxu3 %v1802_v30  ;;  %v547_v30 = vsel %vm52_vm0, %v546_v29, 0.0  ;;  %v2194_v29 = vld [vmem:[%s2313_s1] sm:$0xff] }
0x103a   :  { %1472 = vmatpush.msrb.mxu3 %v1808_v31  ;;  %v981_v31 = vmul.f32 0.0078125, %v980_v53 }
0x103c   :  { %1473 = vmatpush.msrb.mxu3 %v1814_v32  ;;  %v982_v32 = vsel %vm52_vm0, %v981_v31, 0.0 }
0x10b8   :  { %v1185_v25 = vpop.f32.mrf.mxu3 }
0x10b9   :  { %v1188_v28 = vmul.f32 %v1185_v25, %v1185_v25  ;;  %v1211_v33 = vmul.f32 4.0, %v1185_v25 }
0x10bb   :  { %v1189_v48 = vmul.f32 8.0, %v1188_v28  ;;  %v2147_v11 = vsub.f32 %v2102_v60, %v1211_v33 }
0x10bd   :  { %1214 = vst.msk [vmem:[#allocation2 + $0x38] sm:$0xff] %vm52_vm0, %v2147_v11  ;;  %1573 = vmatmul.msk.f32.vlgmr.msra.gmra.mxu0 %vm52_vm0, %v2147_v11  ;;  %v1190_v12 = vsel %vm52_vm0, %v1189_v48, 0.0  ;;  %v2188_v48 = vld [vmem:[%s2317_s5] ss:$0 sm:$0xff] }
0x10be   :  { %1191 = vadd.xlane.f32.xlu1 %v1190_v12 }
0x10c6   :  { %548 = vadd.xlane.f32.xlu1 %v547_v30 }
0x10ce   :  { %983 = vadd.xlane.f32.xlu1 %v982_v32 }
0x1131   :  { %v1192_v60 = vpop.xlane.xlu1 %1191 }
0x1132   :  { %v1193_v41 = vrot.slane %v1192_v60, 4 }
0x1134   :  { %v1194_v38 = vadd.f32 %v1193_v41, %v1192_v60 }
0x1136   :  { %v1195_v62 = vrot.slane %v1194_v38, 2 }
0x1138   :  { %v1196_v42 = vadd.f32 %v1195_v62, %v1194_v38 }
0x1139   :  { %v549_v43 = vpop.xlane.xlu1 %548 }
0x113a   :  { %v1197_v63 = vrot.slane %v1196_v42, 1  ;;  %v550_v2 = vrot.slane %v549_v43, 4  ;;  %v1237_v17 = vpop.f32.mrf.mxu0 }
0x113b   :  { %v1238_v49 = vadd.f32 %v2169_v47, %v1237_v17 }
0x113c   :  { %v1198_v50 = vadd.f32 %v1197_v63, %v1196_v42  ;;  %v551_v53 = vadd.f32 %v550_v2, %v549_v43 }
0x113d   :  { %v1240_v0 = vmax.f32 %v1238_v49, 0.0  ;;  %vm1308_vm2 = vcmp.gt.f32.partialorder %v1238_v49, 0.0  ;;  %v256_v49 = vmul.f32 0.0078125, %v255_v27 }
0x113e   :  { %1603 = vrsqrt.f32 %v1198_v50  ;;  %v552_v1 = vrot.slane %v551_v53, 2  ;;  %vm1206_vm6 = vcmp.eq.f32.partialorder %v1198_v50, inf  ;;  %v1209_v21 = vand.u32 2147483648, %v1198_v50 }
0x113f   :  { %1574 = vmatmul.msk.f32.vlgmr.msra.gmra.mxu2 %vm80_vm1, %v1240_v0  ;;  %vm1208_vm11 = vcmp.eq.f32.partialorder %v1198_v50, 0.0 }
0x1140   :  { %v553_v44 = vadd.f32 %v552_v1, %v551_v53 }
0x1141   :  { %v984_v35 = vpop.xlane.xlu1 %983 }
0x1142   :  { %v985_v45 = vrot.slane %v984_v35, 4  ;;  %v554_v46 = vrot.slane %v553_v44, 1 }
0x1144   :  { %v1604_v7 = vpop.eup %1603  ;;  %v986_v51 = vadd.f32 %v985_v45, %v984_v35  ;;  %v555_v40 = vadd.f32 %v554_v46, %v553_v44  ;;  %v257_v45 = vsel %vm52_vm0, %v256_v49, 0.0 }
0x1145   :  { %v1200_v52 = vmul.f32 %v1604_v7, %v1198_v50 }
0x1146   :  { %v987_v3 = vrot.slane %v986_v51, 2  ;;  %635 = vst.msk [vmem:[%s2321_s9 + $0x3] sm:$0x1] %vm199_vm4, %v555_v40 }
0x1147   :  { %v1201_v4 = vmul.f32 %v1604_v7, %v1200_v52 }
0x1148   :  { %v988_v5 = vadd.f32 %v987_v3, %v986_v51 }
0x1149   :  { %v1202_v6 = vmul.f32 0.5, %v1201_v4 }
0x114a   :  { %v989_v54 = vrot.slane %v988_v5, 1 }
0x114b   :  { %v1203_v56 = vsub.f32 1.5, %v1202_v6 }
0x114c   :  { %v990_v55 = vadd.f32 %v989_v54, %v988_v5 }
0x114d   :  { %v1204_v61 = vmul.f32 %v1604_v7, %v1203_v56 }
0x114e   :  { %1070 = vst.msk [vmem:[%s2321_s9 + $0x6] sm:$0x1] %vm199_vm4, %v990_v55 }
0x114f   :  { %v1205_v14 = vmul.f32 %v1204_v61, %v1198_v50 }
0x1151   :  { %v1207_v25 = vsel %vm1206_vm6, %v1198_v50, %v1205_v14 }
0x1152   :  { %v1210_v28 = vsel %vm1208_vm11, %v1209_v21, %v1207_v25 }
0x1153   :  { %1216 = vst.msk [vmem:[%s2322_s10 + $0x7] sm:$0x1] %vm199_vm4, %v1210_v28 }
0x11c2   :  { %v1261_v33 = vpop.f32.mrf.mxu2 }
0x11c3   :  { %v1262_v12 = vadd.f32 %v2188_v48, %v1261_v33 }
0x11c5   :  { %v1264_v30 = vsub.f32 %v1262_v12, %v2194_v29 }
0x11c7   :  { %v1265_v31 = vand.u32 2147483647, %v1264_v30  ;;  %vm1281_vm13 = vcmp.gt.f32.partialorder %v1264_v30, 0.0  ;;  %v1267_v32 = vmul.f32 0.5, %v1264_v30 }
0x11c8   :  { %v1282_v60 = vsel %vm1281_vm13, 1.0, %v1638_v20 }
0x11c9   :  { %vm2198_vm15 = vcmp.lt.f32.partialorder %v1265_v31, 1.0  ;;  %v2202_v38 = vmul.f32 %v1267_v32, %v1264_v30  ;;  %v2204_v62 = vadd.f32 -0.5, %v1265_v31 }
0x11ca   :  { %v1283_v42 = vsel %vm2198_vm15, %v1264_v30, %v1282_v60 }
0x11cb   :  { %v1284_v43 = vmul.f32 0.0078125, %v1283_v42  ;;  %v1270_v63 = vsel %vm2198_vm15, %v2202_v38, %v2204_v62 }
0x11cc   :  { %v1271_v9 = vmul.f32 0.0078125, %v1270_v63 }
0x11cd   :  { %1576 = vmatmul.msk.f32.vlgmr.msra.gmra.mxu1 %vm52_vm0, %v1284_v43 }
0x11ce   :  { %v1272_v10 = vsel %vm52_vm0, %v1271_v9, 0.0 }
0x124a   :  { %v1305_v2 = vpop.f32.mrf.mxu1 }
0x124b   :  { %v1309_v17 = vsel %vm1308_vm2, %v1305_v2, 0.0 }
0x124c   :  { %1577 = vmatmul.msk.f32.vlgmr.msra.gmra.mxu3 %vm80_vm1, %v1309_v17 }
0x12cf   :  { %v1330_v50 = vpop.f32.mrf.mxu3 }
0x12d0   :  { %v1333_v53 = vmul.f32 %v1330_v50, %v1330_v50  ;;  %v1356_v0 = vmul.f32 4.0, %v1330_v50 }
0x12d2   :  { %v1334_v1 = vmul.f32 8.0, %v1333_v53  ;;  %v2215_v44 = vsub.f32 %v2147_v11, %v1356_v0  ;;  %v691_v11 = vmul.f32 0.0078125, %v690_v26 }
0x12d4   :  { %1359 = vst.msk [vmem:[#allocation2 + $0x40] sm:$0xff] %vm52_vm0, %v2215_v44  ;;  %1578 = vmatmul.msk.f32.vlgmr.msrb.gmra.mxu0 %vm52_vm0, %v2215_v44  ;;  %v1335_v35 = vsel %vm52_vm0, %v1334_v1, 0.0  ;;  %v692_v46 = vsel %vm52_vm0, %v691_v11, 0.0 }
0x12d5   :  { %1336 = vadd.xlane.f32.xlu2 %v1335_v35 }
0x12dd   :  { %258 = vadd.xlane.f32.xlu2 %v257_v45 }
0x12e5   :  { %693 = vadd.xlane.f32.xlu2 %v692_v46 }
0x12ed   :  { %1128 = vadd.xlane.f32.xlu2 %v1127_v23 }
0x1348   :  { %v1337_v24 = vpop.xlane.xlu2 %1336 }
0x1349   :  { %v1338_v27 = vrot.slane %v1337_v24, 4 }
0x134b   :  { %v1339_v7 = vadd.f32 %v1338_v27, %v1337_v24 }
0x134d   :  { %v1340_v8 = vrot.slane %v1339_v7, 2 }
0x134f   :  { %v1341_v51 = vadd.f32 %v1340_v8, %v1339_v7 }
0x1350   :  { %v259_v52 = vpop.xlane.xlu2 %258 }
0x1351   :  { %v1342_v16 = vrot.slane %v1341_v51, 1  ;;  %v260_v19 = vrot.slane %v259_v52, 4  ;;  %v1382_v26 = vpop.f32.mrf.mxu0 }
0x1352   :  { %v2241_v40 = vadd.f32 %v2169_v47, %v1382_v26 }
0x1353   :  { %v1343_v57 = vadd.f32 %v1342_v16, %v1341_v51  ;;  %v261_v3 = vadd.f32 %v260_v19, %v259_v52 }
0x1354   :  { %v1385_v58 = vmax.f32 %v2241_v40, 0.0  ;;  %vm1453_vm8 = vcmp.gt.f32.partialorder %v2241_v40, 0.0 }
0x1355   :  { %1605 = vrsqrt.f32 %v1343_v57  ;;  %v262_v59 = vrot.slane %v261_v3, 2  ;;  %vm1351_vm9 = vcmp.eq.f32.partialorder %v1343_v57, inf  ;;  %v1354_v2 = vand.u32 2147483648, %v1343_v57 }
0x1356   :  { %1579 = vmatmul.msk.f32.vlgmr.msrb.gmra.mxu2 %vm80_vm1, %v1385_v58  ;;  %vm1353_vm12 = vcmp.eq.f32.partialorder %v1343_v57, 0.0 }
0x1357   :  { %v263_v13 = vadd.f32 %v262_v59, %v261_v3 }
0x1358   :  { %v694_v4 = vpop.xlane.xlu2 %693 }
0x1359   :  { %v695_v5 = vrot.slane %v694_v4, 4  ;;  %v264_v6 = vrot.slane %v263_v13, 1 }
0x135b   :  { %v1606_v54 = vpop.eup %1605  ;;  %v696_v56 = vadd.f32 %v695_v5, %v694_v4  ;;  %v265_v61 = vadd.f32 %v264_v6, %v263_v13 }
0x135c   :  { %v1345_v55 = vmul.f32 %v1606_v54, %v1343_v57 }
0x135d   :  { %v697_v14 = vrot.slane %v696_v56, 2  ;;  %345 = vst.msk [vmem:[%s2321_s9 + $0x1] sm:$0x1] %vm199_vm4, %v265_v61 }
0x135e   :  { %v1346_v21 = vmul.f32 %v1606_v54, %v1345_v55 }
0x135f   :  { %v698_v47 = vadd.f32 %v697_v14, %v696_v56 }
0x1360   :  { %v1347_v25 = vmul.f32 0.5, %v1346_v21  ;;  %v1129_v28 = vpop.xlane.xlu2 %1128 }
0x1361   :  { %v699_v33 = vrot.slane %v698_v47, 1  ;;  %v1130_v12 = vrot.slane %v1129_v28, 4 }
0x1362   :  { %v1348_v30 = vsub.f32 1.5, %v1347_v25 }
0x1363   :  { %v700_v31 = vadd.f32 %v699_v33, %v698_v47  ;;  %v1131_v32 = vadd.f32 %v1130_v12, %v1129_v28 }
0x1364   :  { %v1349_v60 = vmul.f32 %v1606_v54, %v1348_v30  ;;  %v401_v54 = vmul.f32 0.0078125, %v400_v18 }
0x1365   :  { %780 = vst.msk [vmem:[%s2321_s9 + $0x4] sm:$0x1] %vm199_vm4, %v700_v31  ;;  %v1132_v42 = vrot.slane %v1131_v32, 2 }
0x1366   :  { %v1350_v43 = vmul.f32 %v1349_v60, %v1343_v57  ;;  %v402_v56 = vsel %vm52_vm0, %v401_v54, 0.0 }
0x1367   :  { %v1133_v17 = vadd.f32 %v1132_v42, %v1131_v32 }
0x1368   :  { %v1352_v50 = vsel %vm1351_vm9, %v1343_v57, %v1350_v43 }
0x1369   :  { %v1355_v53 = vsel %vm1353_vm12, %v1354_v2, %v1352_v50  ;;  %v1134_v0 = vrot.slane %v1133_v17, 1 }
0x136a   :  { %1361 = vst.msk [vmem:[%s2322_s10 + $0x8] sm:$0x1] %vm199_vm4, %v1355_v53 }
0x136b   :  { %v1135_v1 = vadd.f32 %v1134_v0, %v1133_v17 }
0x136d   :  { %1215 = vst.msk [vmem:[%s2321_s9 + $0x7] sm:$0x1] %vm199_vm4, %v1135_v1 }
0x13d9   :  { %v1406_v35 = vpop.f32.mrf.mxu2 }
0x13da   :  { %v1407_v49 = vadd.f32 %v2188_v48, %v1406_v35 }
0x13dc   :  { %v1409_v45 = vsub.f32 %v1407_v49, %v2194_v29 }
0x13de   :  { %v1410_v11 = vand.u32 2147483647, %v1409_v45  ;;  %vm1426_vm3 = vcmp.gt.f32.partialorder %v1409_v45, 0.0  ;;  %v1412_v46 = vmul.f32 0.5, %v1409_v45 }
0x13df   :  { %v1427_v22 = vsel %vm1426_vm3, 1.0, %v1638_v20 }
0x13e0   :  { %vm1411_vm7 = vcmp.lt.f32.partialorder %v1410_v11, 1.0  ;;  %v1413_v23 = vmul.f32 %v1412_v46, %v1409_v45  ;;  %v1580_v24 = vadd.f32 -0.5, %v1410_v11 }
0x13e1   :  { %v1428_v27 = vsel %vm1411_vm7, %v1409_v45, %v1427_v22 }
0x13e2   :  { %v1429_v7 = vmul.f32 0.0078125, %v1428_v27  ;;  %v1415_v8 = vsel %vm1411_vm7, %v1413_v23, %v1580_v24 }
0x13e3   :  { %v1416_v51 = vmul.f32 0.0078125, %v1415_v8 }
0x13e4   :  { %1581 = vmatmul.msk.f32.vlgmr.msrb.gmra.mxu1 %vm52_vm0, %v1429_v7 }
0x13e5   :  { %v1417_v52 = vsel %vm52_vm0, %v1416_v51, 0.0 }
0x13e6   :  { %1418 = vadd.xlane.f32.xlu1 %v1417_v52 }
0x1459   :  { %v1419_v48 = vpop.xlane.xlu1 %1418 }
0x145a   :  { %v1420_v16 = vrot.slane %v1419_v48, 4 }
0x145c   :  { %v1421_v29 = vadd.f32 %v1420_v16, %v1419_v48 }
0x145e   :  { %v1422_v19 = vrot.slane %v1421_v29, 2 }
0x1460   :  { %v1423_v26 = vadd.f32 %v1422_v19, %v1421_v29 }
0x1461   :  { %v1450_v57 = vpop.f32.mrf.mxu1 }
0x1462   :  { %v1424_v20 = vrot.slane %v1423_v26, 1  ;;  %v1454_v3 = vsel %vm1453_vm8, %v1450_v57, 0.0 }
0x1463   :  { %1582 = vmatmul.msk.f32.vlgmr.msrb.gmra.mxu3 %vm80_vm1, %v1454_v3 }
0x1464   :  { %v1425_v58 = vadd.f32 %v1424_v20, %v1423_v26 }
0x1466   :  { %1505 = vst.msk [vmem:[%s2321_s9 + $0x9] sm:$0x1] %vm199_vm4, %v1425_v58 }
0x14e6   :  { %v1475_v59 = vpop.f32.mrf.mxu3 }
0x14e7   :  { %v1478_v13 = vmul.f32 %v1475_v59, %v1475_v59  ;;  %v1501_v4 = vmul.f32 4.0, %v1475_v59 }
0x14e9   :  { %v1479_v5 = vmul.f32 8.0, %v1478_v13  ;;  %v1502_v6 = vsub.f32 %v2215_v44, %v1501_v4  ;;  %v836_v44 = vmul.f32 0.0078125, %v835_v34 }
0x14eb   :  { %1504 = vst.msk [vmem:[#allocation2 + $0x48] sm:$0xff] %vm52_vm0, %v1502_v6  ;;  %v1480_v40 = vsel %vm52_vm0, %v1479_v5, 0.0  ;;  %v837_v55 = vsel %vm52_vm0, %v836_v44, 0.0 }
0x14ec   :  { %1481 = vadd.xlane.f32.xlu0 %v1480_v40  ;;  %1519 = dma.vmem_to_hbm [thread:$0]  %s1512_s4, 1280, %s1514_s30, [#allocation3], %s1640_s11, %s1640_s11, %s1641_s12  }
0x14f4   :  { %403 = vadd.xlane.f32.xlu0 %v402_v56 }
0x14fc   :  { %838 = vadd.xlane.f32.xlu0 %v837_v55 }
0x1504   :  { %1273 = vadd.xlane.f32.xlu0 %v1272_v10 }
0x155f   :  { %v1482_v15 = vpop.xlane.xlu0 %1481 }
0x1560   :  { %v1483_v18 = vrot.slane %v1482_v15, 4 }
0x1562   :  { %v1484_v36 = vadd.f32 %v1483_v18, %v1482_v15 }
0x1564   :  { %v1485_v37 = vrot.slane %v1484_v36, 2 }
0x1566   :  { %v1486_v39 = vadd.f32 %v1485_v37, %v1484_v36 }
0x1567   :  { %v404_v34 = vpop.xlane.xlu0 %403 }
0x1568   :  { %v1487_v41 = vrot.slane %v1486_v39, 1  ;;  %v405_v38 = vrot.slane %v404_v34, 4 }
0x156a   :  { %v1488_v62 = vadd.f32 %v1487_v41, %v1486_v39  ;;  %v406_v63 = vadd.f32 %v405_v38, %v404_v34 }
0x156c   :  { %1607 = vrsqrt.f32 %v1488_v62  ;;  %v407_v61 = vrot.slane %v406_v63, 2  ;;  %vm1496_vm0 = vcmp.eq.f32.partialorder %v1488_v62, inf  ;;  %v1499_v45 = vand.u32 2147483648, %v1488_v62 }
0x156d   :  { %vm1498_vm1 = vcmp.eq.f32.partialorder %v1488_v62, 0.0 }
0x156e   :  { %v408_v14 = vadd.f32 %v407_v61, %v406_v63 }
0x156f   :  { %v839_v21 = vpop.xlane.xlu0 %838 }
0x1570   :  { %v840_v47 = vrot.slane %v839_v21, 4  ;;  %v409_v25 = vrot.slane %v408_v14, 1 }
0x1572   :  { %v1608_v28 = vpop.eup %1607  ;;  %v841_v33 = vadd.f32 %v840_v47, %v839_v21  ;;  %v410_v30 = vadd.f32 %v409_v25, %v408_v14 }
0x1573   :  { %v1490_v12 = vmul.f32 %v1608_v28, %v1488_v62 }
0x1574   :  { %v842_v31 = vrot.slane %v841_v33, 2  ;;  %490 = vst.msk [vmem:[%s2321_s9 + $0x2] sm:$0x1] %vm199_vm4, %v410_v30 }
0x1575   :  { %v1491_v32 = vmul.f32 %v1608_v28, %v1490_v12 }
0x1576   :  { %v843_v60 = vadd.f32 %v842_v31, %v841_v33 }
0x1577   :  { %v1492_v42 = vmul.f32 0.5, %v1491_v32  ;;  %v1274_v43 = vpop.xlane.xlu0 %1273 }
0x1578   :  { %v844_v2 = vrot.slane %v843_v60, 1  ;;  %v1275_v17 = vrot.slane %v1274_v43, 4 }
0x1579   :  { %v1493_v50 = vsub.f32 1.5, %v1492_v42 }
0x157a   :  { %v845_v53 = vadd.f32 %v844_v2, %v843_v60  ;;  %v1276_v0 = vadd.f32 %v1275_v17, %v1274_v43 }
0x157b   :  { %v1494_v1 = vmul.f32 %v1608_v28, %v1493_v50 }
0x157c   :  { %925 = vst.msk [vmem:[%s2321_s9 + $0x5] sm:$0x1] %vm199_vm4, %v845_v53  ;;  %v1277_v35 = vrot.slane %v1276_v0, 2 }
0x157d   :  { %v1495_v49 = vmul.f32 %v1494_v1, %v1488_v62 }
0x157e   :  { %v1278_v11 = vadd.f32 %v1277_v35, %v1276_v0 }
0x157f   :  { %v1497_v46 = vsel %vm1496_vm0, %v1488_v62, %v1495_v49 }
0x1580   :  { %v1500_v22 = vsel %vm1498_vm1, %v1499_v45, %v1497_v46  ;;  %v1279_v23 = vrot.slane %v1278_v11, 1 }
0x1581   :  { %1506 = vst.msk [vmem:[%s2322_s10 + $0x9] sm:$0x1] %vm199_vm4, %v1500_v22 }
0x1582   :  { %v1280_v24 = vadd.f32 %v1279_v23, %v1278_v11 }
0x1584   :  { %1360 = vst.msk [vmem:[%s2321_s9 + $0x8] sm:$0x1] %vm199_vm4, %v1280_v24 }
0x1585   :  { %1636 = dma.done.wait [#allocation3], 1280  }
0x1586   :  { %1637 = vsyncadd [#allocation3], 4294966016 }
0x1587   :  { %1532 = vsyncpa [#allocation3], 1 }

</bundles_post_ra>
